<compile_context>
chip_gen: v5e
topology: v5e:2x2
jax: 0.10.0
libtpu: 0.0.40
codegen_flags: <defaults>
</compile_context>

<pallas_src>
import jax
import jax.numpy as jnp
from jax.experimental import pallas as pl
from jax.experimental.pallas import tpu as pltpu


# ----------------------------- config ---------------------------------------
INPUT_DIMS = 3          # coordinate dim (fixed to 3 in the PyTorch module)
PROJ_DIMS = 128         # proj=True  -> proj_dims = 128
NEG_SLOPE = 0.01        # nn.LeakyReLU default negative slope
HARDTANH_MIN, HARDTANH_MAX = -10.0, 10.0


def _leaky_relu(x):
    # max(x, a*x) == LeakyReLU for 0 < a < 1 (2 VPU ops vs 3 for where/select)
    return jnp.maximum(x, NEG_SLOPE * x)


def _round_up(x, m):
    return (x + m - 1) // m * m


def _pad_rows(a, rows):
    return jnp.pad(a, ((0, rows - a.shape[0]),) + ((0, 0),) * (a.ndim - 1))


# ----------------------------- kernel ---------------------------------------
def nvp_layers_kernel(
    # per-(batch, tile) data
    y0_ref,                                    # (3, T) f32
    # resident (constant index_map) parameters
    mask_ref,                                  # (L, 8, 1) f32
    wp1_ref, bp1_ref,                          # (256, 3), (256, 1) f32
    w1p2_ref,                                  # (L, 2H, 256) bf16  (proj 2nd Linear folded)
    # tiny per-(layer, batch) bias (F-part + b1 + folded bp2), per-step DMA (<1 KB)
    fb_ref,                                    # (2H, 1) f32
    # resident fused (block-diagonal) coupling weights
    w2_ref, b2_ref,                            # (L, 2H, 2H) bf16, (L, 2H, 1) f32
    w3_ref, b3_ref,                            # (L, 8, 2H) f32,  (L, 8, 1) f32
    # output
    out_ref,                                   # (4, T): rows 0..2 = x, row 3 = running ldj
    # scratch carried across the layer axis
    y_carry, ldj_carry,                        # (3, T) f32, (1, T) f32
):
    layer = pl.program_id(2)

    @pl.when(layer == 0)
    def _():
        y_carry[...] = y0_ref[...]
        ldj_carry[...] = jnp.zeros_like(ldj_carry)

    y = y_carry[...]                            # (3, T)
    mask = mask_ref[layer][0:INPUT_DIMS]        # (3, 1)
    y1 = y * mask

    # shared projection hidden: Linear(3, 256) + LeakyReLU.  Kept in f32 (K=3 is
    # nearly free on the MXU) for accuracy of s / t downstream.
    h = _leaky_relu(
        jnp.dot(wp1_ref[...], y1, preferred_element_type=jnp.float32)
        + bp1_ref[...])                                                  # (256, T)

    # Coupling 1st Linear with the proj 2nd Linear folded into w1p2 and the
    # F-part + biases folded into the per-(layer, batch) column bias fb.
    h1 = _leaky_relu(
        jnp.dot(w1p2_ref[layer], h.astype(jnp.bfloat16),
                preferred_element_type=jnp.float32) + fb_ref[...])       # (2H, T)
    h2 = _leaky_relu(
        jnp.dot(w2_ref[layer], h1.astype(jnp.bfloat16),
                preferred_element_type=jnp.float32) + b2_ref[layer])     # (2H, T)
    # Final fused (block-diag) Linear in f32: rows 0..2 = s, rows 3..5 = t.
    st = (jnp.dot(w3_ref[layer], h2, preferred_element_type=jnp.float32)
          + b3_ref[layer])                                               # (8, T)

    s = jnp.clip(st[0:3, :], HARDTANH_MIN, HARDTANH_MAX)   # Hardtanh(-10, 10)
    t = st[3:6, :]

    # x = y1 + (1 - mask) * ((y - t) * exp(-s)) ; ldj += (-s).sum over coords
    x = y1 + (1.0 - mask) * ((y - t) * jnp.exp(-s))
    ldj_carry[...] = ldj_carry[...] - (s[0:1, :] + s[1:2, :] + s[2:3, :])
    y_carry[...] = x
    out_ref[...] = jnp.concatenate([x, ldj_carry[...]], axis=0)   # lane-dense (4, T)


# ----------------------------- weight packing --------------------------------
def pack_params(params, F):
    """Fuse map_s/map_t, fold proj 2nd Linear and the F-part into biases; channel-major."""
    wp1, bp1, wp2, bp2 = params["proj"]   # (3,256),(1,256),(256,128),(1,128)
    fd = F.shape[1]
    H = params["layers"][0]["weights"][2].shape[0]
    H2 = 2 * H
    H2p = _round_up(H2, 16)               # bf16 sublane packing (also covers f32's 8)

    wp1_cm = wp1.T.astype(jnp.float32)    # (256, 3)
    bp1_cm = bp1.T.astype(jnp.float32)    # (256, 1)
    wp2_cm = wp2.T.astype(jnp.float32)    # (128, 256)
    bp2_cm = bp2.T.astype(jnp.float32)    # (128, 1)
    F32 = F.astype(jnp.float32)

    masks, w1p2, fb, w2, b2, w3, b3 = ([] for _ in range(7))
    # TODO(synk): if hidden_size >= 128, split the block-diagonal w2/w3 into two
    # per-branch matmuls (the fuse does 2x MACs on explicit zeros once 2H exceeds
    # one MXU tile); fused form kept while 2H <= 128/256.
    for layer in params["layers"]:
        (ws1, bs1, ws2, bs2, ws3, bs3,
         wt1, bt1, wt2, bt2, wt3, bt3) = layer["weights"]
        masks.append(jnp.zeros((8, 1), jnp.float32).at[:3, 0].set(layer["mask"]))

        # 1st Linear: split F / proj parts, stack s|t on the output axis
        w1f_cm = jnp.concatenate([ws1[:fd], wt1[:fd]], axis=1).T      # (2H, fd)
        w1p_cm = jnp.concatenate([ws1[fd:], wt1[fd:]], axis=1).T      # (2H, 128)
        b1_cm = jnp.concatenate([bs1, bt1], axis=1).T                 # (2H, 1)

        # fold proj 2nd Linear (exact: it is linear after the LeakyReLU)
        w1p2_l = w1p_cm @ wp2_cm                                      # (2H, 256)
        b1_fold = b1_cm + w1p_cm @ bp2_cm                             # (2H, 1)
        # fold F @ W1f into a per-(layer, batch) column bias (exact, f32)
        fb_l = (w1f_cm @ F32.T + b1_fold).T                           # (B, 2H)

        w1p2.append(_pad_rows(w1p2_l, H2p))
        fb.append(_pad_rows(fb_l.T, H2p).T[:, :, None])               # (B, 2Hp, 1)

        # 2nd Linear: block-diagonal so the s/t branches stay decoupled
        w2b = jnp.zeros((H2p, H2p), jnp.float32)
        w2b = w2b.at[:H, :H].set(ws2.T).at[H:H2, H:H2].set(wt2.T)
        w2.append(w2b)
        b2l = jnp.zeros((H2p, 1), jnp.float32)
        b2.append(b2l.at[:H, 0].set(bs2[0]).at[H:H2, 0].set(bt2[0]))

        # 3rd Linear: block-diagonal, rows 0..2 = s, rows 3..5 = t (rows 6..7 pad)
        w3b = jnp.zeros((8, H2p), jnp.float32)
        w3b = w3b.at[:3, :H].set(ws3.T).at[3:6, H:H2].set(wt3.T)
        w3.append(w3b)
        b3l = jnp.zeros((8, 1), jnp.float32)
        b3.append(b3l.at[:3, 0].set(bs3[0]).at[3:6, 0].set(bt3[0]))

    return dict(
        wp1=wp1_cm, bp1=bp1_cm,
        masks=jnp.stack(masks),
        w1p2=jnp.stack(w1p2).astype(jnp.bfloat16),
        fb=jnp.stack(fb).astype(jnp.float32),            # (L, B, 2Hp, 1)
        w2=jnp.stack(w2).astype(jnp.bfloat16),
        b2=jnp.stack(b2).astype(jnp.float32),
        w3=jnp.stack(w3).astype(jnp.float32),            # f32: feeds exp(-s)
        b3=jnp.stack(b3).astype(jnp.float32),
        H2p=H2p,
    )


# ----------------------------- wrapper ---------------------------------------
def simple_nvp_forward(x, F, params, *, tile_n=2048, return_all=True):
    """SimpleNVP.forward(x, F, mode='direct') with normalize=False, proj=True.

    x: (B, M, 3) float32, F: (B, feature_dims) float32.
    Returns (y_seq: list of (B, M, 3), ldj: (B, M)).
    return_all=False writes only the final layer's y to HBM (ldj unchanged).
    tile_n: points per grid step (multiple of 128; sweep 1024-4096).
    """
    B, M, D = x.shape
    assert D == INPUT_DIMS and F.shape[0] == B
    L = len(params["layers"])

    packed = pack_params(params, F)
    H2p = packed["H2p"]
    P2 = 2 * PROJ_DIMS

    # Points live on the 128-lane axis -> tile must be a multiple of 128.
    tile = min(_round_up(tile_n, 128), _round_up(M, 128))
    n_tiles = _round_up(M, tile) // tile
    # v7x has 2 TensorCores sharded over the "parallel" grid axes; prefer >= 2
    # parallel steps so both cores get work (no-op on single-TC v5e/v6e).
    if B * n_tiles < 2 and tile > 128:
        tile = max(128, (tile // 2 // 128) * 128)
        n_tiles = _round_up(M, tile) // tile
    Mp = n_tiles * tile

    # channel-major per batch: (B, 3, Mp). normalize=False -> mu=0, sigma=1.
    y_cm = jnp.transpose(x.astype(jnp.float32), (0, 2, 1))
    if Mp != M:
        y_cm = jnp.pad(y_cm, ((0, 0), (0, 0), (0, Mp - M)))

    grid = (B, n_tiles, L)   # batch/tiles outer ("parallel"), layers inner ("arbitrary")

    in_specs = [
        pl.BlockSpec((None, INPUT_DIMS, tile), lambda b, i, l: (b, 0, i)),   # y0
        pl.BlockSpec((L, 8, 1), lambda b, i, l: (0, 0, 0)),                  # masks (resident)
        pl.BlockSpec((P2, INPUT_DIMS), lambda b, i, l: (0, 0)),              # wp1 (resident)
        pl.BlockSpec((P2, 1), lambda b, i, l: (0, 0)),                       # bp1 (resident)
        pl.BlockSpec((L, H2p, P2), lambda b, i, l: (0, 0, 0)),               # w1p2 (resident)
        pl.BlockSpec((None, None, H2p, 1), lambda b, i, l: (l, b, 0, 0)),    # fb (tiny per-step)
        pl.BlockSpec((L, H2p, H2p), lambda b, i, l: (0, 0, 0)),              # w2 (resident)
        pl.BlockSpec((L, H2p, 1), lambda b, i, l: (0, 0, 0)),                # b2 (resident)
        pl.BlockSpec((L, 8, H2p), lambda b, i, l: (0, 0, 0)),                # w3 (resident)
        pl.BlockSpec((L, 8, 1), lambda b, i, l: (0, 0, 0)),                  # b3 (resident)
    ]
    if return_all:
        out_specs = pl.BlockSpec((None, None, INPUT_DIMS + 1, tile),
                                 lambda b, i, l: (l, b, 0, i))
        out_shape = jax.ShapeDtypeStruct((L, B, INPUT_DIMS + 1, Mp), jnp.float32)
    else:
        # block index constant over the layer axis -> only the last layer's
        # contents are written back to HBM.
        out_specs = pl.BlockSpec((None, INPUT_DIMS + 1, tile),
                                 lambda b, i, l: (b, 0, i))
        out_shape = jax.ShapeDtypeStruct((B, INPUT_DIMS + 1, Mp), jnp.float32)

    out = pl.pallas_call(
        nvp_layers_kernel,
        out_shape=out_shape,
        grid_spec=pltpu.PrefetchScalarGridSpec(
            num_scalar_prefetch=0,
            grid=grid,
            in_specs=in_specs,
            out_specs=out_specs,
            scratch_shapes=[pltpu.VMEM((INPUT_DIMS, tile), jnp.float32),
                            pltpu.VMEM((1, tile), jnp.float32)],
        ),
        compiler_params=pltpu.CompilerParams(
            dimension_semantics=("parallel", "parallel", "arbitrary"),
            # actual use is a few MiB; 32 MiB leaves headroom on v5e/v6e (128 MiB)
            # and stays at half of v7x's 64 MiB physical VMEM.
            vmem_limit_bytes=32 * 1024 * 1024,
        ),
    )(y_cm, packed["masks"], packed["wp1"], packed["bp1"],
      packed["w1p2"], packed["fb"], packed["w2"], packed["b2"],
      packed["w3"], packed["b3"])

    if return_all:
        y_all = out[:, :, :INPUT_DIMS, :M]                      # (L, B, 3, M)
        ldj = out[L - 1, :, INPUT_DIMS, :M]                     # running ldj @ last layer
        y_seq = [jnp.transpose(y_all[l], (0, 2, 1)) for l in range(L)]
    else:
        y_seq = [jnp.transpose(out[:, :INPUT_DIMS, :M], (0, 2, 1))]
        ldj = out[:, INPUT_DIMS, :M]
    return y_seq, ldj


# ----------------------------- param init ------------------------------------
def _linear_init(key, din, dout, scale=0.1):
    kw, kb = jax.random.split(key)
    w = scale * jax.random.normal(kw, (din, dout), jnp.float32)
    b = scale * jax.random.normal(kb, (dout,), jnp.float32)
    return w, b.reshape(1, dout)


def init_params(key, n_layers, feature_dims, hidden_size):
    keys = jax.random.split(key, 2 + n_layers)

    # shared ProjectionLayer: Linear(3, 256) -> LeakyReLU -> Linear(256, 128)
    wp1, bp1 = _linear_init(keys[0], INPUT_DIMS, 2 * PROJ_DIMS)
    wp2, bp2 = _linear_init(keys[1], 2 * PROJ_DIMS, PROJ_DIMS)

    # deterministic masks: 2 of 3 coordinates on, rotating the zero slot
    # (PyTorch draws them with randperm; any valid 2-of-3 buffer is equivalent)
    base_masks = [
        jnp.array([1.0, 1.0, 0.0], jnp.float32),
        jnp.array([0.0, 1.0, 1.0], jnp.float32),
        jnp.array([1.0, 0.0, 1.0], jnp.float32),
    ]

    layers = []
    for i in range(n_layers):
        lk = jax.random.split(keys[2 + i], 6)
        # map_s: Linear(fd+128,H)->LReLU->Linear(H,H)->LReLU->Linear(H,3)->Hardtanh
        ws1, bs1 = _linear_init(lk[0], feature_dims + PROJ_DIMS, hidden_size)
        ws2, bs2 = _linear_init(lk[1], hidden_size, hidden_size)
        ws3, bs3 = _linear_init(lk[2], hidden_size, INPUT_DIMS)
        # map_t: same (no hardtanh)
        wt1, bt1 = _linear_init(lk[3], feature_dims + PROJ_DIMS, hidden_size)
        wt2, bt2 = _linear_init(lk[4], hidden_size, hidden_size)
        wt3, bt3 = _linear_init(lk[5], hidden_size, INPUT_DIMS)
        layers.append({
            "mask": base_masks[i % 3],
            "weights": (ws1, bs1, ws2, bs2, ws3, bs3,
                        wt1, bt1, wt2, bt2, wt3, bt3),
        })

    # TODO(synk): normalize=True branch (self.scales + ELU sigma) and
    # mode='inverse' (CouplingLayer.inverse) are not implemented; this models
    # the default normalize=False, mode='direct' configuration.
    return {"proj": (wp1, bp1, wp2, bp2), "layers": layers}


# ----------------------------- pure-JAX reference -----------------------------
def reference_forward(x, F, params):
    """f32 reference mirroring SimpleNVP.forward (normalize=False, direct)."""
    B, M, _ = x.shape
    fd = F.shape[1]
    Fe = jnp.broadcast_to(F[:, None, :], (B, M, fd))
    wp1, bp1, wp2, bp2 = params["proj"]

    def leaky(v):
        return jnp.where(v > 0, v, NEG_SLOPE * v)

    def projection(y1):
        return leaky(y1 @ wp1 + bp1) @ wp2 + bp2

    y = x.astype(jnp.float32)
    ldj = jnp.zeros((B, M), jnp.float32)
    y_seq = []
    for layer in params["layers"]:
        m = layer["mask"].reshape(1, 1, INPUT_DIMS)
        (ws1, bs1, ws2, bs2, ws3, bs3,
         wt1, bt1, wt2, bt2, wt3, bt3) = layer["weights"]
        y1 = y * m
        F_y1 = jnp.concatenate([Fe, projection(y1)], axis=-1)
        hs = leaky(F_y1 @ ws1 + bs1)
        hs = leaky(hs @ ws2 + bs2)
        s = jnp.clip(hs @ ws3 + bs3, HARDTANH_MIN, HARDTANH_MAX)
        ht = leaky(F_y1 @ wt1 + bt1)
        ht = leaky(ht @ wt2 + bt2)
        t = ht @ wt3 + bt3
        y = y1 + (1.0 - m) * ((y - t) * jnp.exp(-s))
        ldj = ldj + (-s).sum(-1)
        y_seq.append(y)
    return y_seq, ldj


# ----------------------------- main -------------------------------------------
if __name__ == "__main__":
    key = jax.random.PRNGKey(0)
    k_x, k_f, k_p = jax.random.split(key, 3)

    B, M, feature_dims, hidden_size, n_layers = 2, 8, 8, 32, 2

    x = jax.random.normal(k_x, (B, M, INPUT_DIMS), jnp.float32)
    F = jax.random.normal(k_f, (B, feature_dims), jnp.float32)
    params = init_params(k_p, n_layers, feature_dims, hidden_size)

    y_seq, ldj = simple_nvp_forward(x, F, params)
    jax.block_until_ready((y_seq, ldj))

    # correctness vs f32 reference (two matmuls run bf16 on the MXU -> loose tol)
    y_ref_seq, ldj_ref = reference_forward(x, F, params)
    err_y = max(float(jnp.max(jnp.abs(a - b))) for a, b in zip(y_seq, y_ref_seq))
    err_l = float(jnp.max(jnp.abs(ldj - ldj_ref)))

    assert len(y_seq) == n_layers
    assert y_seq[-1].shape == (B, M, INPUT_DIMS)
    assert ldj.shape == (B, M)
    assert bool(jnp.all(jnp.isfinite(y_seq[-1]))) and bool(jnp.all(jnp.isfinite(ldj)))
    assert err_y < 8e-2 and err_l < 8e-2, (err_y, err_l)

    # also exercise the final-layer-only output path
    y_last, ldj2 = simple_nvp_forward(x, F, params, return_all=False)
    jax.block_until_ready((y_last, ldj2))
    assert float(jnp.max(jnp.abs(y_last[0] - y_seq[-1]))) < 1e-5
    assert float(jnp.max(jnp.abs(ldj2 - ldj))) < 1e-5

    print("KERNEL_OK")
</pallas_src>

<mosaic_0001>
module attributes {stable_mosaic.version = 11 : i64} {
  func.func @nvp_layers_kernel(%arg0: i32, %arg1: i32, %arg2: i32, %arg3: memref<1x3x128xf32, #tpu.memory_space<vmem>>, %arg4: memref<2x8x1xf32, #tpu.memory_space<vmem>>, %arg5: memref<256x3xf32, #tpu.memory_space<vmem>>, %arg6: memref<256x1xf32, #tpu.memory_space<vmem>>, %arg7: memref<2x64x256xbf16, #tpu.memory_space<vmem>>, %arg8: memref<1x1x64x1xf32, #tpu.memory_space<vmem>>, %arg9: memref<2x64x64xbf16, #tpu.memory_space<vmem>>, %arg10: memref<2x64x1xf32, #tpu.memory_space<vmem>>, %arg11: memref<2x8x64xf32, #tpu.memory_space<vmem>>, %arg12: memref<2x8x1xf32, #tpu.memory_space<vmem>>, %arg13: memref<1x1x4x128xf32, #tpu.memory_space<vmem>>, %arg14: memref<3x128xf32, #tpu.memory_space<vmem>>, %arg15: memref<1x128xf32, #tpu.memory_space<vmem>>) attributes {dimension_semantics = [#tpu.dimension_semantics<parallel>, #tpu.dimension_semantics<parallel>, #tpu.dimension_semantics<arbitrary>], iteration_bounds = array<i64: 2, 1, 2>, scalar_prefetch = 0 : i64, scratch_operands = 2 : i64, tpu.core_type = #tpu.core_type<tc>, window_params = [{transform_indices = @transform_0, window_bounds = array<i64: 1, 3, 128>}, {pipeline_mode = #tpu.pipeline_mode<synchronous>, transform_indices = @transform_1, window_bounds = array<i64: 2, 8, 1>}, {pipeline_mode = #tpu.pipeline_mode<synchronous>, transform_indices = @transform_2, window_bounds = array<i64: 256, 3>}, {pipeline_mode = #tpu.pipeline_mode<synchronous>, transform_indices = @transform_3, window_bounds = array<i64: 256, 1>}, {pipeline_mode = #tpu.pipeline_mode<synchronous>, transform_indices = @transform_4, window_bounds = array<i64: 2, 64, 256>}, {transform_indices = @transform_5, window_bounds = array<i64: 1, 1, 64, 1>}, {pipeline_mode = #tpu.pipeline_mode<synchronous>, transform_indices = @transform_6, window_bounds = array<i64: 2, 64, 64>}, {pipeline_mode = #tpu.pipeline_mode<synchronous>, transform_indices = @transform_7, window_bounds = array<i64: 2, 64, 1>}, {pipeline_mode = #tpu.pipeline_mode<synchronous>, transform_indices = @transform_8, window_bounds = array<i64: 2, 8, 64>}, {pipeline_mode = #tpu.pipeline_mode<synchronous>, transform_indices = @transform_9, window_bounds = array<i64: 2, 8, 1>}, {transform_indices = @transform_10, window_bounds = array<i64: 1, 1, 4, 128>}]} {
    %c0_i32 = arith.constant 0 : i32
    %0 = arith.cmpi eq, %arg2, %c0_i32 : i32
    %1 = arith.extui %0 : i1 to i32
    %c0_i32_0 = arith.constant 0 : i32
    %2 = arith.cmpi ne, %1, %c0_i32_0 : i32
    scf.if %2 {
      %c0_44 = arith.constant 0 : index
      %c0_45 = arith.constant 0 : index
      %c0_46 = arith.constant 0 : index
      %82 = vector.load %arg3[%c0_44, %c0_45, %c0_46] : memref<1x3x128xf32, #tpu.memory_space<vmem>>, vector<1x3x128xf32>
      %83 = vector.shape_cast %82 : vector<1x3x128xf32> to vector<3x128xf32>
      %c0_47 = arith.constant 0 : index
      %c0_48 = arith.constant 0 : index
      %84 = vector.load %arg14[%c0_47, %c0_48] : memref<3x128xf32, #tpu.memory_space<vmem>>, vector<3x128xf32>
      tpu.vector_store %arg14[%c0_47, %c0_48], %83 {strides = array<i32>} : memref<3x128xf32, #tpu.memory_space<vmem>>, vector<3x128xf32>,
      %cst_49 = arith.constant 0.000000e+00 : f32
      %85 = vector.broadcast %cst_49 : f32 to vector<1x128xf32>
      %c0_50 = arith.constant 0 : index
      %c0_51 = arith.constant 0 : index
      %86 = vector.load %arg15[%c0_50, %c0_51] : memref<1x128xf32, #tpu.memory_space<vmem>>, vector<1x128xf32>
      tpu.vector_store %arg15[%c0_50, %c0_51], %85 {strides = array<i32>} : memref<1x128xf32, #tpu.memory_space<vmem>>, vector<1x128xf32>,
    } else {
    }
    %c0 = arith.constant 0 : index
    %c0_1 = arith.constant 0 : index
    %3 = vector.load %arg14[%c0, %c0_1] : memref<3x128xf32, #tpu.memory_space<vmem>>, vector<3x128xf32>
    %4 = arith.index_cast %arg2 : i32 to index
    %c0_2 = arith.constant 0 : index
    %c0_3 = arith.constant 0 : index
    %5 = vector.load %arg4[%4, %c0_2, %c0_3] : memref<2x8x1xf32, #tpu.memory_space<vmem>>, vector<1x8x1xf32>
    %6 = vector.shape_cast %5 : vector<1x8x1xf32> to vector<8x1xf32>
    %7 = vector.extract_strided_slice %6 {offsets = [0, 0], sizes = [3, 1], strides = [1, 1]} : vector<8x1xf32> to vector<3x1xf32>
    %8 = vector.broadcast %7 : vector<3x1xf32> to vector<3x128xf32>
    %9 = arith.mulf %3, %8 : vector<3x128xf32>
    %c0_4 = arith.constant 0 : index
    %c0_5 = arith.constant 0 : index
    %10 = vector.load %arg5[%c0_4, %c0_5] : memref<256x3xf32, #tpu.memory_space<vmem>>, vector<256x3xf32>
    %cst = arith.constant dense<0.000000e+00> : vector<256x128xf32>
    %11 = tpu.matmul %10, %9, %cst {dimension_numbers = #tpu.dot_dimension_numbers<[1], [0], [0], [1], [0, 0, 1, 1], [], []>} : vector<256x3xf32>, vector<3x128xf32>, vector<256x128xf32> -> vector<256x128xf32>
    %c0_6 = arith.constant 0 : index
    %c0_7 = arith.constant 0 : index
    %12 = vector.load %arg6[%c0_6, %c0_7] : memref<256x1xf32, #tpu.memory_space<vmem>>, vector<256x1xf32>
    %13 = vector.broadcast %12 : vector<256x1xf32> to vector<256x128xf32>
    %14 = arith.addf %11, %13 : vector<256x128xf32>
    %cst_8 = arith.constant 0.00999999977 : f32
    %15 = vector.broadcast %cst_8 : f32 to vector<256x128xf32>
    %16 = arith.mulf %15, %14 : vector<256x128xf32>
    %17 = arith.maximumf %14, %16 : vector<256x128xf32>
    %18 = arith.index_cast %arg2 : i32 to index
    %c0_9 = arith.constant 0 : index
    %c0_10 = arith.constant 0 : index
    %19 = vector.load %arg7[%18, %c0_9, %c0_10] : memref<2x64x256xbf16, #tpu.memory_space<vmem>>, vector<1x64x256xbf16>
    %20 = vector.shape_cast %19 : vector<1x64x256xbf16> to vector<64x256xbf16>
    %21 = arith.truncf %17 : vector<256x128xf32> to vector<256x128xbf16>
    %cst_11 = arith.constant dense<0.000000e+00> : vector<64x128xf32>
    %22 = tpu.matmul %20, %21, %cst_11 {dimension_numbers = #tpu.dot_dimension_numbers<[1], [0], [0], [1], [0, 0, 1, 1], [], []>} : vector<64x256xbf16>, vector<256x128xbf16>, vector<64x128xf32> -> vector<64x128xf32>
    %c0_12 = arith.constant 0 : index
    %c0_13 = arith.constant 0 : index
    %c0_14 = arith.constant 0 : index
    %c0_15 = arith.constant 0 : index
    %23 = vector.load %arg8[%c0_12, %c0_13, %c0_14, %c0_15] : memref<1x1x64x1xf32, #tpu.memory_space<vmem>>, vector<1x1x64x1xf32>
    %24 = vector.shape_cast %23 : vector<1x1x64x1xf32> to vector<64x1xf32>
    %25 = vector.broadcast %24 : vector<64x1xf32> to vector<64x128xf32>
    %26 = arith.addf %22, %25 : vector<64x128xf32>
    %cst_16 = arith.constant 0.00999999977 : f32
    %27 = vector.broadcast %cst_16 : f32 to vector<64x128xf32>
    %28 = arith.mulf %27, %26 : vector<64x128xf32>
    %29 = arith.maximumf %26, %28 : vector<64x128xf32>
    %30 = arith.index_cast %arg2 : i32 to index
    %c0_17 = arith.constant 0 : index
    %c0_18 = arith.constant 0 : index
    %31 = vector.load %arg9[%30, %c0_17, %c0_18] : memref<2x64x64xbf16, #tpu.memory_space<vmem>>, vector<1x64x64xbf16>
    %32 = vector.shape_cast %31 : vector<1x64x64xbf16> to vector<64x64xbf16>
    %33 = arith.truncf %29 : vector<64x128xf32> to vector<64x128xbf16>
    %cst_19 = arith.constant dense<0.000000e+00> : vector<64x128xf32>
    %34 = tpu.matmul %32, %33, %cst_19 {dimension_numbers = #tpu.dot_dimension_numbers<[1], [0], [0], [1], [0, 0, 1, 1], [], []>} : vector<64x64xbf16>, vector<64x128xbf16>, vector<64x128xf32> -> vector<64x128xf32>
    %35 = arith.index_cast %arg2 : i32 to index
    %c0_20 = arith.constant 0 : index
    %c0_21 = arith.constant 0 : index
    %36 = vector.load %arg10[%35, %c0_20, %c0_21] : memref<2x64x1xf32, #tpu.memory_space<vmem>>, vector<1x64x1xf32>
    %37 = vector.shape_cast %36 : vector<1x64x1xf32> to vector<64x1xf32>
    %38 = vector.broadcast %37 : vector<64x1xf32> to vector<64x128xf32>
    %39 = arith.addf %34, %38 : vector<64x128xf32>
    %cst_22 = arith.constant 0.00999999977 : f32
    %40 = vector.broadcast %cst_22 : f32 to vector<64x128xf32>
    %41 = arith.mulf %40, %39 : vector<64x128xf32>
    %42 = arith.maximumf %39, %41 : vector<64x128xf32>
    %43 = arith.index_cast %arg2 : i32 to index
    %c0_23 = arith.constant 0 : index
    %c0_24 = arith.constant 0 : index
    %44 = vector.load %arg11[%43, %c0_23, %c0_24] : memref<2x8x64xf32, #tpu.memory_space<vmem>>, vector<1x8x64xf32>
    %45 = vector.shape_cast %44 : vector<1x8x64xf32> to vector<8x64xf32>
    %cst_25 = arith.constant dense<0.000000e+00> : vector<8x128xf32>
    %46 = tpu.matmul %45, %42, %cst_25 {dimension_numbers = #tpu.dot_dimension_numbers<[1], [0], [0], [1], [0, 0, 1, 1], [], []>} : vector<8x64xf32>, vector<64x128xf32>, vector<8x128xf32> -> vector<8x128xf32>
    %47 = arith.index_cast %arg2 : i32 to index
    %c0_26 = arith.constant 0 : index
    %c0_27 = arith.constant 0 : index
    %48 = vector.load %arg12[%47, %c0_26, %c0_27] : memref<2x8x1xf32, #tpu.memory_space<vmem>>, vector<1x8x1xf32>
    %49 = vector.shape_cast %48 : vector<1x8x1xf32> to vector<8x1xf32>
    %50 = vector.broadcast %49 : vector<8x1xf32> to vector<8x128xf32>
    %51 = arith.addf %46, %50 : vector<8x128xf32>
    %52 = vector.extract_strided_slice %51 {offsets = [0, 0], sizes = [3, 128], strides = [1, 1]} : vector<8x128xf32> to vector<3x128xf32>
    %cst_28 = arith.constant -1.000000e+01 : f32
    %cst_29 = arith.constant 1.000000e+01 : f32
    %53 = vector.broadcast %cst_28 : f32 to vector<3x128xf32>
    %54 = arith.maximumf %53, %52 : vector<3x128xf32>
    %55 = vector.broadcast %cst_29 : f32 to vector<3x128xf32>
    %56 = arith.minimumf %55, %54 : vector<3x128xf32>
    %57 = vector.extract_strided_slice %51 {offsets = [3, 0], sizes = [3, 128], strides = [1, 1]} : vector<8x128xf32> to vector<3x128xf32>
    %cst_30 = arith.constant 1.000000e+00 : f32
    %58 = vector.broadcast %cst_30 : f32 to vector<3x1xf32>
    %59 = arith.subf %58, %7 : vector<3x1xf32>
    %60 = arith.subf %3, %57 : vector<3x128xf32>
    %cst_31 = arith.constant 0.000000e+00 : f32
    %61 = vector.broadcast %cst_31 : f32 to vector<3x128xf32>
    %62 = arith.subf %61, %56 : vector<3x128xf32>
    %63 = math.exp %62 : vector<3x128xf32>
    %64 = arith.mulf %60, %63 : vector<3x128xf32>
    %65 = vector.broadcast %59 : vector<3x1xf32> to vector<3x128xf32>
    %66 = arith.mulf %65, %64 : vector<3x128xf32>
    %67 = arith.addf %9, %66 : vector<3x128xf32>
    %c0_32 = arith.constant 0 : index
    %c0_33 = arith.constant 0 : index
    %68 = vector.load %arg15[%c0_32, %c0_33] : memref<1x128xf32, #tpu.memory_space<vmem>>, vector<1x128xf32>
    %69 = vector.extract_strided_slice %56 {offsets = [0, 0], sizes = [1, 128], strides = [1, 1]} : vector<3x128xf32> to vector<1x128xf32>
    %70 = vector.extract_strided_slice %56 {offsets = [1, 0], sizes = [1, 128], strides = [1, 1]} : vector<3x128xf32> to vector<1x128xf32>
    %71 = arith.addf %69, %70 : vector<1x128xf32>
    %72 = vector.extract_strided_slice %56 {offsets = [2, 0], sizes = [1, 128], strides = [1, 1]} : vector<3x128xf32> to vector<1x128xf32>
    %73 = arith.addf %71, %72 : vector<1x128xf32>
    %74 = arith.subf %68, %73 : vector<1x128xf32>
    %c0_34 = arith.constant 0 : index
    %c0_35 = arith.constant 0 : index
    %75 = vector.load %arg15[%c0_34, %c0_35] : memref<1x128xf32, #tpu.memory_space<vmem>>, vector<1x128xf32>
    tpu.vector_store %arg15[%c0_34, %c0_35], %74 {strides = array<i32>} : memref<1x128xf32, #tpu.memory_space<vmem>>, vector<1x128xf32>,
    %c0_36 = arith.constant 0 : index
    %c0_37 = arith.constant 0 : index
    %76 = vector.load %arg14[%c0_36, %c0_37] : memref<3x128xf32, #tpu.memory_space<vmem>>, vector<3x128xf32>
    tpu.vector_store %arg14[%c0_36, %c0_37], %67 {strides = array<i32>} : memref<3x128xf32, #tpu.memory_space<vmem>>, vector<3x128xf32>,
    %c0_38 = arith.constant 0 : index
    %c0_39 = arith.constant 0 : index
    %77 = vector.load %arg15[%c0_38, %c0_39] : memref<1x128xf32, #tpu.memory_space<vmem>>, vector<1x128xf32>
    %78 = tpu.concatenate %67, %77 in 0 : vector<3x128xf32>, vector<1x128xf32> -> vector<4x128xf32>
    %c0_40 = arith.constant 0 : index
    %c0_41 = arith.constant 0 : index
    %c0_42 = arith.constant 0 : index
    %c0_43 = arith.constant 0 : index
    %79 = vector.load %arg13[%c0_40, %c0_41, %c0_42, %c0_43] : memref<1x1x4x128xf32, #tpu.memory_space<vmem>>, vector<1x1x4x128xf32>
    %80 = vector.shape_cast %79 : vector<1x1x4x128xf32> to vector<4x128xf32>
    %81 = vector.shape_cast %78 : vector<4x128xf32> to vector<1x1x4x128xf32>
    tpu.vector_store %arg13[%c0_40, %c0_41, %c0_42, %c0_43], %81 {strides = array<i32>} : memref<1x1x4x128xf32, #tpu.memory_space<vmem>>, vector<1x1x4x128xf32>,
    return
  }
  func.func @transform_0(%arg0: i32, %arg1: i32, %arg2: i32) -> (i32, i32, i32) {
    %c0_i32 = arith.constant 0 : i32
    %c0_i32_0 = arith.constant 0 : i32
    return %arg0, %c0_i32, %arg1 : i32, i32, i32
  }
  func.func @transform_1(%arg0: i32, %arg1: i32, %arg2: i32) -> (i32, i32, i32) {
    %c0_i32 = arith.constant 0 : i32
    %c0_i32_0 = arith.constant 0 : i32
    %c0_i32_1 = arith.constant 0 : i32
    %c0_i32_2 = arith.constant 0 : i32
    return %c0_i32, %c0_i32_0, %c0_i32_1 : i32, i32, i32
  }
  func.func @transform_2(%arg0: i32, %arg1: i32, %arg2: i32) -> (i32, i32) {
    %c0_i32 = arith.constant 0 : i32
    %c0_i32_0 = arith.constant 0 : i32
    %c0_i32_1 = arith.constant 0 : i32
    return %c0_i32, %c0_i32_0 : i32, i32
  }
  func.func @transform_3(%arg0: i32, %arg1: i32, %arg2: i32) -> (i32, i32) {
    %c0_i32 = arith.constant 0 : i32
    %c0_i32_0 = arith.constant 0 : i32
    %c0_i32_1 = arith.constant 0 : i32
    return %c0_i32, %c0_i32_0 : i32, i32
  }
  func.func @transform_4(%arg0: i32, %arg1: i32, %arg2: i32) -> (i32, i32, i32) {
    %c0_i32 = arith.constant 0 : i32
    %c0_i32_0 = arith.constant 0 : i32
    %c0_i32_1 = arith.constant 0 : i32
    %c0_i32_2 = arith.constant 0 : i32
    return %c0_i32, %c0_i32_0, %c0_i32_1 : i32, i32, i32
  }
  func.func @transform_5(%arg0: i32, %arg1: i32, %arg2: i32) -> (i32, i32, i32, i32) {
    %c0_i32 = arith.constant 0 : i32
    %c0_i32_0 = arith.constant 0 : i32
    %c0_i32_1 = arith.constant 0 : i32
    return %arg2, %arg0, %c0_i32, %c0_i32_0 : i32, i32, i32, i32
  }
  func.func @transform_6(%arg0: i32, %arg1: i32, %arg2: i32) -> (i32, i32, i32) {
    %c0_i32 = arith.constant 0 : i32
    %c0_i32_0 = arith.constant 0 : i32
    %c0_i32_1 = arith.constant 0 : i32
    %c0_i32_2 = arith.constant 0 : i32
    return %c0_i32, %c0_i32_0, %c0_i32_1 : i32, i32, i32
  }
  func.func @transform_7(%arg0: i32, %arg1: i32, %arg2: i32) -> (i32, i32, i32) {
    %c0_i32 = arith.constant 0 : i32
    %c0_i32_0 = arith.constant 0 : i32
    %c0_i32_1 = arith.constant 0 : i32
    %c0_i32_2 = arith.constant 0 : i32
    return %c0_i32, %c0_i32_0, %c0_i32_1 : i32, i32, i32
  }
  func.func @transform_8(%arg0: i32, %arg1: i32, %arg2: i32) -> (i32, i32, i32) {
    %c0_i32 = arith.constant 0 : i32
    %c0_i32_0 = arith.constant 0 : i32
    %c0_i32_1 = arith.constant 0 : i32
    %c0_i32_2 = arith.constant 0 : i32
    return %c0_i32, %c0_i32_0, %c0_i32_1 : i32, i32, i32
  }
  func.func @transform_9(%arg0: i32, %arg1: i32, %arg2: i32) -> (i32, i32, i32) {
    %c0_i32 = arith.constant 0 : i32
    %c0_i32_0 = arith.constant 0 : i32
    %c0_i32_1 = arith.constant 0 : i32
    %c0_i32_2 = arith.constant 0 : i32
    return %c0_i32, %c0_i32_0, %c0_i32_1 : i32, i32, i32
  }
  func.func @transform_10(%arg0: i32, %arg1: i32, %arg2: i32) -> (i32, i32, i32, i32) {
    %c0_i32 = arith.constant 0 : i32
    %c0_i32_0 = arith.constant 0 : i32
    return %arg2, %arg0, %c0_i32, %arg1 : i32, i32, i32, i32
  }
}

</mosaic_0001>

<bundles_post_ra>
// kernel: tpu_custom_call.1
= control target key start
LH: loop header
LB: loop body
LE: loop exit
PB: predicated region body
PF: predicated region fallthrough
CT: control target
= control target key end

     0   :  { %15 = vsyncpa [#allocation5], 0  ;;  %s2382_s0 = inlined_call_operand.vmem [shape: f32[2,3,128], index: 0, kind: input, shape index: {}]   ;;  %s2383_s1 = inlined_call_operand.vmem [shape: f32[2,8,1], index: 1, kind: input, shape index: {}]   ;;  %s2384_s2 = inlined_call_operand.vmem [shape: f32[256,3], index: 2, kind: input, shape index: {}]   ;;  %s2385_s3 = inlined_call_operand.vmem [shape: f32[256,1], index: 3, kind: input, shape index: {}]   ;;  %s2386_s4 = inlined_call_operand.vmem [shape: bf16[2,64,256], index: 4, kind: input, shape index: {}]   ;;  %s2387_s5 = inlined_call_operand.vmem [shape: f32[2,2,64,1], index: 5, kind: input, shape index: {}]   ;;  %s2388_s6 = inlined_call_operand.vmem [shape: bf16[2,64,64], index: 6, kind: input, shape index: {}]   ;;  %s2389_s7 = inlined_call_operand.vmem [shape: f32[2,64,1], index: 7, kind: input, shape index: {}]   ;;  %s2390_s8 = inlined_call_operand.vmem [shape: f32[2,8,64], index: 8, kind: input, shape index: {}]   ;;  %s2391_s9 = inlined_call_operand.vmem [shape: f32[2,8,1], index: 9, kind: input, shape index: {}]   ;;  %s2392_s10 = inlined_call_operand.hbm [shape: f32[2,2,4,128], index: 10, kind: output, shape index: {}]  }
   0x1   :  { %17 = vsyncpa [#allocation5 + $0x1], 0  ;;  %s1828_s13 = smov 0   ;;  %s1830_s14 = smov 0  }
   0x2   :  { %s1832_s15 = smov 0   ;;  %s1834_s16 = smov 0  }
   0x3   :  { %s1836_s17 = smov 0   ;;  %s1838_s18 = smov 0  }
   0x4   :  { %s1840_s19 = smov 0   ;;  %s1842_s20 = smov 0  }
   0x5 LB: > { %2401 = sst [smem:[#allocation7_spill]] %s1741_s13  ;;  %s1472_s21 = sadd.s32 4294967295, %s1769_s20   ;;  %s1769_s20 = sphi %s1842_s20, %s23_s20   ;;  %s1765_s19 = sphi %s1840_s19, %s2419_s19   ;;  %s1761_s18 = sphi %s1838_s18, %s2418_s18   ;;  %s1757_s17 = sphi %s1836_s17, %s2417_s17   ;;  %s1753_s16 = sphi %s1834_s16, %s2422_s16   ;;  %s1749_s15 = sphi %s1832_s15, %s2415_s15   ;;  %s1745_s14 = sphi %s1830_s14, %s2421_s14   ;;  %s1741_s13 = sphi %s1828_s13, %s2420_s13  }
   0x6   : > { %2402 = sst [smem:[#allocation8_spill]] %s1749_s15  ;;  %s1473_s22 = sadd.s32 4294967294, %s1769_s20  }
   0x7   : > { %2403 = sst [smem:[#allocation9_spill]] %s1761_s18  ;;  %s35_s23 = sadd.s32 1, %s1761_s18 }
   0x8   : > { %2404 = sst [smem:[#allocation10_spill]] %s1765_s19  ;;  %p36_p0 = scmp.ge.s32.totalorder %s35_s23, 2 }
   0x9   : > { %s42_s24 = sadd.s32 1, %s1765_s19  ;;  %p287_p1 = scmp.ne.s32.totalorder %s1749_s15, %s1745_s14 }
   0xa   : > { %p288_p2 = scmp.eq.s32.totalorder %s1472_s21, 3  ;;  %s2424_s23 = smov (%p36_p0, %s35_s23), 0 }
   0xb   : > { %2405 = sst [smem:[#allocation11_spill]] %s2424_s23  ;;  %s2426_s24 = smov (!%p36_p0, %s42_s24), %s1765_s19 }
   0xc   : > { %s270_s25 = ssub.s32 %s1761_s18, %s2424_s23  ;;  %p1879_p3 = por %p288_p2, %p287_p1 }
   0xd   : > { %p44_p4 = scmp.ge.s32.totalorder %s2426_s24, 2  ;;  %p293_p5 = scmp.ne.s32.totalorder %s1745_s14, %s1741_s13 }
   0xe   : > { %p294_p6 = scmp.eq.s32.totalorder %s1473_s22, 3  ;;  %p1476_p7 = scmp.ge.s32.totalorder %s1769_s20, 1 }
   0xf   : > { %s2428_s24 = smov (%p44_p4, %s2426_s24), 0  ;;  %p358_p9 = scmp.lt.s32.totalorder %s1769_s20, 5 }
  0x10   : > { %2407 = sst [smem:[#allocation12_spill]] %s2428_s24  ;;  %p1888_p8 = por %p294_p6, %p293_p5 }
  0x11   : > { %s271_s28 = ssub.s32 %s1765_s19, %s2428_s24  ;;  %s277_s29 = sadd.s32 1, %s1749_s15 }
  0x12   : > { %s2408_s27 = scalar_select %p1888_p8, 1, 0 }
  0x13   : > { %s272_s30 = sor.u32 %s271_s28, %s270_s25  ;;  %p359_p10 = pnand %p1476_p7, %p358_p9 }
  0x14   : > { %2409 = sst [smem:[#allocation13_spill]] %s2408_s27  ;;  %p275_p11 = scmp.eq.s32.totalorder %s272_s30, 0 }
  0x15   : > { %362 = sbr.rel (%p359_p10) target bundleno = 1017 (0x3f9), region = 60  ;;  %s2400_s12 = sand.u32 (!%p359_p10), 1, %s1745_s14  }
  0x16   : > { %s1897_s11 = scalar_select %p275_p11, %s1749_s15, %s277_s29  }
  0x17   : > { %p407_p12 = scmp.lt.s32.totalorder (!%p359_p10), %s1757_s17, 1  ;;  %s1903_s21 = sshll.u32 (!%p359_p10), %s2400_s12, 2 }
  0x18   : > { %2410 = sst [smem:[#allocation14_spill]] %s1897_s11  ;;  %p414_p13 = scmp.lt.s32.totalorder (!%p359_p10), %s1753_s16, 1 }
  0x19   : > { %s406_s12 = scalar_lea.vmem (!%p359_p10), [#allocation4], %s1903_s21  ;;  %p1482_p0 = scmp.ne.s32.totalorder (!%p359_p10), %s1753_s16, 0 }
  0x1a   : > { %s408_s22 = scalar_select %p407_p12, %s1757_s17, 1 }
  0x1b   : > { %s415_s25 = scalar_select %p414_p13, %s1753_s16, 1 }
  0x1c   : > { %s1478_s28 = sshll.u32 %s408_s22, 2  ;;  %s1479_s30 = sshll.u32 %s408_s22, 3 }
  0x1d   : > { %s413_s23 = scalar_lea.vmem %s2382_s0, %s1478_s28  ;;  %s1480_s19 = sshll.u32 %s415_s25, 4 }
  0x1e   : > { %s420_s18 = sadd.s32 %s1480_s19, %s1479_s30  ;;  %427 = sbr.rel (%p1482_p0) target bundleno = 38 (0x26), region = 64 }
  0x1f   : > { %s1481_s11 = sshll.u32 %s420_s18, 3 }
  0x20   : > { %s1914_s13 = scalar_lea.vmem %s2387_s5, %s1481_s11 }
  0x23   : > { %v428_v0 = vld [vmem:[%s413_s23] sm:$0x7]  ;;  %v1771_v1 = vmov 0.0  }
  0x24   : > { %429 = vst [vmem:[#allocation2] sm:$0x7] %v428_v0 }
  0x25   : > { %430 = vst [vmem:[#allocation3] sm:$0x1] %v1771_v1 }
  0x26 PF: > { %s1919_s24 = sshll.u32 %s1753_s16, 3  ;;  %v1772_v2 = vmov 0   ;;  %v503_v4 = vld [vmem:[%s2385_s3 + $0xf0] sm:$0xff]  ;;  %v502_v5 = vld [vmem:[%s2385_s3 + $0xe8] sm:$0xff]  ;;  %v504_v6 = vld [vmem:[%s2385_s3 + $0xf8] sm:$0xff]  ;;  %s1580_s27 = sshll.u32 %s1753_s16, 6 }
  0x27   : > { %1669 = vset.pattern.permute.xlu0 %v1772_v2  ;;  %s433_s15 = scalar_lea.vmem %s2383_s1, %s1919_s24  ;;  %1670 = vset.pattern.permute.xlu1 %v1772_v2  ;;  %v499_v7 = vld [vmem:[%s2385_s3 + $0xd0] sm:$0xff]  ;;  %v484_v9 = vld [vmem:[%s2385_s3 + $0x58] sm:$0xff]  ;;  %v485_v10 = vld [vmem:[%s2385_s3 + $0x60] sm:$0xff]  ;;  %s2024_s30 = scalar_lea.vmem %s2389_s7, %s1580_s27  ;;  %vm762_vm0 = vcmask 1042432   ;;  %vm665_vm1 = vcmask 23552   ;;  %vm1216_vm2 = vcmask 523264  }
  0x28   : > { %v1925_v3 = vld [vmem:[%s433_s15] sm:$0xff]  ;;  %1671 = vset.pattern.permute.xlu2 %v1772_v2  ;;  %662 = vperm.xlu1 %1670, %v504_v6   ;;  %v487_v8 = vld [vmem:[%s2385_s3 + $0x70] sm:$0xff]  ;;  %v500_v12 = vld [vmem:[%s2385_s3 + $0xd8] sm:$0xff]  ;;  %s1276_s25 = scalar_lea.vmem %s2391_s9, %s1919_s24  ;;  %s2295_s22 = scalar_lea.vmem %s2386_s4, %s1580_s27 }
  0x29   : > { %437 = vperm.xlu0 %1669, %v1925_v3   ;;  %v481_v11 = vld [vmem:[%s2385_s3 + $0x40] sm:$0xff]  ;;  %v496_v13 = vld [vmem:[%s2385_s3 + $0xb8] sm:$0xff]  ;;  %v482_v18 = vld [vmem:[%s2385_s3 + $0x48] sm:$0xff]  ;;  %s1589_s27 = sshll.u32 %s1753_s16, 5  ;;  %s1576_s15 = sshll.u32 %s1753_s16, 1 }
  0x2a   : > { %v488_v14 = vld [vmem:[%s2385_s3 + $0x78] sm:$0xff]  ;;  %v497_v15 = vld [vmem:[%s2385_s3 + $0xc0] sm:$0xff]  ;;  %v478_v19 = vld [vmem:[%s2385_s3 + $0x28] sm:$0xff]  ;;  %s1133_s29 = scalar_lea.vmem %s2388_s6, %s1589_s27  ;;  %s2411_s27 = sand.u32 1, %s1745_s14  }
  0x2b   : > { %582 = vperm.xlu2 %1671, %v488_v14   ;;  %v493_v16 = vld [vmem:[%s2385_s3 + $0xa0] sm:$0xff]  ;;  %v486_v20 = vld [vmem:[%s2385_s3 + $0x68] sm:$0xff]  ;;  %v479_v21 = vld [vmem:[%s2385_s3 + $0x30] sm:$0xff] }
  0x2c   : > { %v501_v17 = vld [vmem:[%s2385_s3 + $0xe0] sm:$0xff]  ;;  %v475_v22 = vld [vmem:[%s2385_s3 + $0x10] sm:$0xff]  ;;  %v494_v24 = vld [vmem:[%s2385_s3 + $0xa8] sm:$0xff] }
  0x2d   : > { %v483_v23 = vld [vmem:[%s2385_s3 + $0x50] sm:$0xff]  ;;  %v490_v25 = vld [vmem:[%s2385_s3 + $0x88] sm:$0xff]  ;;  %v476_v30 = vld [vmem:[%s2385_s3 + $0x18] sm:$0xff] }
  0x2e   : > { %v498_v26 = vld [vmem:[%s2385_s3 + $0xc8] sm:$0xff]  ;;  %v491_v27 = vld [vmem:[%s2385_s3 + $0x90] sm:$0xff]  ;;  %v480_v32 = vld [vmem:[%s2385_s3 + $0x38] sm:$0xff] }
  0x2f   : > { %v976_v28 = vld [vmem:[%s1914_s13 + $0x30] sm:$0xff]  ;;  %v975_v31 = vld [vmem:[%s1914_s13 + $0x28] sm:$0xff]  ;;  %v473_v33 = vld [vmem:[%s2385_s3] sm:$0xff] }
  0x30   : > { %577 = vperm.xlu1 %1670, %v487_v8   ;;  %v495_v29 = vld [vmem:[%s2385_s3 + $0xb0] sm:$0xff]  ;;  %v970_v34 = vld [vmem:[%s1914_s13] sm:$0xff]  ;;  %v492_v37 = vld [vmem:[%s2385_s3 + $0x98] sm:$0xff] }
  0x31   : > { %657 = vperm.xlu0 %1669, %v503_v4   ;;  %v477_v35 = vld [vmem:[%s2385_s3 + $0x20] sm:$0xff]  ;;  %v1154_v36 = vld [vmem:[%s2024_s30 + $0x30] sm:$0xff]  ;;  %v458_v42 = vld [vmem:[%s2384_s2 + $0x88] sm:$0xff] }
  0x32   : > { %v2030_v38 = vld [vmem:[#allocation2] sm:$0x7]  ;;  %v466_v43 = vld [vmem:[%s2384_s2 + $0xc8] sm:$0xff]  ;;  %v1151_v44 = vld [vmem:[%s2024_s30 + $0x18] sm:$0xff] }
  0x33   : > { %647 = vperm.xlu2 %1671, %v501_v17   ;;  %v441_v41 = vld [vmem:[%s2384_s2] sm:$0xff]  ;;  %v977_v46 = vld [vmem:[%s1914_s13 + $0x38] sm:$0xff]  ;;  %v442_v47 = vld [vmem:[%s2384_s2 + $0x8] sm:$0xff] }
  0x34   : > { %v489_v45 = vld [vmem:[%s2385_s3 + $0x80] sm:$0xff]  ;;  %v459_v48 = vld [vmem:[%s2384_s2 + $0x90] sm:$0xff]  ;;  %v474_v51 = vld [vmem:[%s2385_s3 + $0x8] sm:$0xff] }
  0x35   : > { %v467_v49 = vld [vmem:[%s2384_s2 + $0xd0] sm:$0xff]  ;;  %v1148_v50 = vld [vmem:[%s2024_s30] sm:$0xff]  ;;  %v460_v54 = vld [vmem:[%s2384_s2 + $0x98] sm:$0xff] }
  0x36   : > { %v972_v52 = vld [vmem:[%s1914_s13 + $0x10] sm:$0xff]  ;;  %v468_v55 = vld [vmem:[%s2384_s2 + $0xd8] sm:$0xff]  ;;  %v971_v56 = vld [vmem:[%s1914_s13 + $0x8] sm:$0xff] }
  0x37   : > { %v443_v53 = vld [vmem:[%s2384_s2 + $0x10] sm:$0xff]  ;;  %v444_v57 = vld [vmem:[%s2384_s2 + $0x18] sm:$0xff]  ;;  %v461_v58 = vld [vmem:[%s2384_s2 + $0xa0] sm:$0xff] }
  0x38   : > { %567 = vperm.xlu1 %1670, %v485_v10   ;;  %v469_v59 = vld [vmem:[%s2384_s2 + $0xe0] sm:$0xff]  ;;  %v1153_v62 = vld [vmem:[%s2024_s30 + $0x28] sm:$0xff]  ;;  %v973_v4 = vld [vmem:[%s1914_s13 + $0x18] sm:$0xff] }
  0x39   : > { %652 = vperm.xlu0 %1669, %v502_v5   ;;  %v974_v61 = vld [vmem:[%s1914_s13 + $0x20] sm:$0xff]  ;;  %v462_v0 = vld [vmem:[%s2384_s2 + $0xa8] sm:$0xff]  ;;  %v1150_v5 = vld [vmem:[%s2024_s30 + $0x10] sm:$0xff] }
  0x3a   : > { %v445_v63 = vld [vmem:[%s2384_s2 + $0x20] sm:$0xff]  ;;  %v470_v1 = vld [vmem:[%s2384_s2 + $0xe8] sm:$0xff]  ;;  %v463_v8 = vld [vmem:[%s2384_s2 + $0xb0] sm:$0xff] }
  0x3b   : > { %572 = vperm.xlu2 %1671, %v486_v20   ;;  %v446_v6 = vld [vmem:[%s2384_s2 + $0x28] sm:$0xff]  ;;  %v464_v14 = vld [vmem:[%s2384_s2 + $0xb8] sm:$0xff]  ;;  %v465_v20 = vld [vmem:[%s2384_s2 + $0xc0] sm:$0xff] }
  0x40   : > { %642 = vperm.xlu1 %1670, %v500_v12   ;;  %v1277_v12 = vld [vmem:[%s1276_s25] sm:$0xff]  ;;  %s1342_s25 = scalar_lea.sflag [#allocation5], %s2411_s27 }
  0x41   : > { %637 = vperm.xlu0 %1669, %v499_v7  }
  0x43   : > { %557 = vperm.xlu2 %1671, %v483_v23   ;;  %v449_v23 = vld [vmem:[%s2384_s2 + $0x40] sm:$0xff] }
  0x48   : > { %627 = vperm.xlu1 %1670, %v497_v15   ;;  %v472_v15 = vld [vmem:[%s2384_s2 + $0xf8] sm:$0xff] }
  0x49   : > { %562 = vperm.xlu0 %1669, %v484_v9   ;;  %v471_v9 = vld [vmem:[%s2384_s2 + $0xf0] sm:$0xff] }
  0x4b   : > { %632 = vperm.xlu2 %1671, %v498_v26  }
  0x50   : > { %552 = vperm.xlu1 %1670, %v482_v18   ;;  %v1152_v18 = vld [vmem:[%s2024_s30 + $0x20] sm:$0xff] }
  0x51   : > { %547 = vperm.xlu0 %1669, %v481_v11   ;;  %v1155_v11 = vld [vmem:[%s2024_s30 + $0x38] sm:$0xff] }
  0x53   : > { %617 = vperm.xlu2 %1671, %v495_v29  }
  0x58   : > { %537 = vperm.xlu1 %1670, %v479_v21  }
  0x59   : > { %622 = vperm.xlu0 %1669, %v496_v13   ;;  %v447_v13 = vld [vmem:[%s2384_s2 + $0x30] sm:$0xff] }
  0x5b   : > { %542 = vperm.xlu2 %1671, %v480_v32  }
  0x60   : > { %612 = vperm.xlu1 %1670, %v494_v24  }
  0x61   : > { %607 = vperm.xlu0 %1669, %v493_v16  }
  0x63   : > { %527 = vperm.xlu2 %1671, %v477_v35  }
  0x68   : > { %597 = vperm.xlu1 %1670, %v491_v27  }
  0x69   : > { %532 = vperm.xlu0 %1669, %v478_v19   ;;  %v448_v19 = vld [vmem:[%s2384_s2 + $0x38] sm:$0xff] }
  0x6b   : > { %602 = vperm.xlu2 %1671, %v492_v37   ;;  %v453_v37 = vld [vmem:[%s2384_s2 + $0x60] sm:$0xff] }
  0x70   : > { %522 = vperm.xlu1 %1670, %v476_v30  }
  0x71   : > { %517 = vperm.xlu0 %1669, %v475_v22   ;;  %v1149_v22 = vld [vmem:[%s2024_s30 + $0x8] sm:$0xff]  ;;  %s1274_s30 = scalar_lea.vmem %s2390_s8, %s1919_s24  ;;  %s1353_s24 = sadd.s32 %s1757_s17, %s1576_s15 }
  0x72   : > { %s1577_s23 = sshll.u32 %s1353_s24, 2 }
  0x73   : > { %587 = vperm.xlu2 %1671, %v489_v45   ;;  %s1355_s16 = scalar_lea.hbm %s2392_s10, %s1577_s23 }
  0x74   : > { %s1359_s17 = sshll.u32 %s1355_s16, 4  ;;  %s1360_s17 = int_to_ptr.hbm [resolvable:$true] %s1359_s17 }
  0x75   : > { %s1689_s28 = sshra.s32 %s1360_s17, 4  ;;  %s1690_s28 = int_to_ptr.hbm [resolvable:$true] %s1689_s28 }
  0x76   : > { %p1696_p5 = scmp.lt.s32.totalorder %s1690_s28, %s2392_s10 }
  0x78   : > { %507 = vperm.xlu1 %1670, %v473_v33  }
  0x79   : > { %592 = vperm.xlu0 %1669, %v490_v25   ;;  %v1308_v25 = vsub.f32 1.0, %v1925_v3 }
  0x7b   : > { %512 = vperm.xlu2 %1671, %v474_v51  }
  0x80   : > { %1015 = vperm.xlu1 %1670, %v977_v46   ;;  %v455_v46 = vld [vmem:[%s2384_s2 + $0x70] sm:$0xff] }
  0x81   : > { %1010 = vperm.xlu0 %1669, %v976_v28   ;;  %v450_v28 = vld [vmem:[%s2384_s2 + $0x48] sm:$0xff] }
  0x83   : > { %1000 = vperm.xlu2 %1671, %v974_v61  }
  0x85   : > { %v2113_v2 = vpop.permute.xlu2 %582 }
  0x88   : > { %990 = vperm.xlu1 %1670, %v972_v52  }
  0x89   : > { %1005 = vperm.xlu0 %1669, %v975_v31   ;;  %v451_v31 = vld [vmem:[%s2384_s2 + $0x50] sm:$0xff] }
  0x8b   : > { %995 = vperm.xlu2 %1671, %v973_v4  }
  0x8d   : > { %v2134_v10 = vpop.permute.xlu2 %647 }
  0x90   : > { %985 = vperm.xlu1 %1670, %v971_v56  }
  0x91   : > { %980 = vperm.xlu0 %1669, %v970_v34   ;;  %v452_v34 = vld [vmem:[%s2384_s2 + $0x58] sm:$0xff] }
  0x93   : > { %1193 = vperm.xlu2 %1671, %v1155_v11  }
  0x95   : > { %v2155_v17 = vpop.permute.xlu2 %572 }
  0x98   : > { %1183 = vperm.xlu1 %1670, %v1153_v62  }
  0x99   : > { %1188 = vperm.xlu0 %1669, %v1154_v36  }
  0x9a   : > { %v2100_v60 = vpop.permute.xlu1 %662 }
  0x9b   : > { %v438_v39 = vpop.permute.xlu0 %437  ;;  %1178 = vperm.xlu2 %1671, %v1152_v18  }
  0x9c   : > { %v2033_v40 = vmul.f32 %v438_v39, %v2030_v38 }
  0x9d   : > { %v2172_v24 = vpop.permute.xlu2 %557 }
  0x9e   : > { %1484 = vmatpush.msk.msra.mxu0 %vm762_vm0, %v2033_v40  ;;  %1594 = vmatpush.msk.msra.mxu1 %vm762_vm0, %v2033_v40 }
  0x9f   : > { %1595 = vmatpush.msk.msra.mxu3 %vm762_vm0, %v2033_v40  ;;  %1485 = vmatmul.msk.f32.vlgmr.msra.gmra.mxu0 %vm665_vm1, %v441_v41 }
  0xa0   : > { %1502 = vmatmul.msk.f32.vlgmr.msra.gmra.mxu1 %vm665_vm1, %v458_v42  ;;  %1510 = vmatmul.msk.f32.vlgmr.msra.gmra.mxu3 %vm665_vm1, %v466_v43  ;;  %v454_v42 = vld [vmem:[%s2384_s2 + $0x68] sm:$0xff] }
  0xa1   : > { %1173 = vperm.xlu0 %1669, %v1151_v44   ;;  %1168 = vperm.xlu1 %1670, %v1150_v5  }
  0xa2   : > { %v2123_v7 = vpop.permute.xlu1 %577 }
  0xa3   : > { %1163 = vperm.xlu2 %1671, %v1149_v22   ;;  %v2176_v26 = vpop.permute.xlu0 %657 }
  0xa5   : > { %v2183_v29 = vpop.permute.xlu2 %632 }
  0xa7   : > { %1486 = vmatmul.msk.f32.gmra.mxu0 %vm665_vm1, %v442_v47 }
  0xa8   : > { %1503 = vmatmul.msk.f32.gmra.mxu1 %vm665_vm1, %v459_v48  ;;  %1511 = vmatmul.msk.f32.gmra.mxu3 %vm665_vm1, %v467_v49 }
  0xa9   : > { %1158 = vperm.xlu0 %1669, %v1148_v50   ;;  %1280 = vperm.xlu1 %1670, %v1277_v12   ;;  %v456_v50 = vld [vmem:[%s2384_s2 + $0x78] sm:$0xff] }
  0xaa   : > { %v2150_v16 = vpop.permute.xlu1 %567 }
  0xab   : > { %1319 = vperm.xlu2 %1671, %v1308_v25   ;;  %v2186_v30 = vpop.permute.xlu0 %652 }
  0xad   : > { %v2194_v32 = vpop.permute.xlu2 %617 }
  0xaf   : > { %1487 = vmatmul.msk.f32.gmra.mxu0 %vm665_vm1, %v443_v53 }
  0xb0   : > { %1504 = vmatmul.msk.f32.gmra.mxu1 %vm665_vm1, %v460_v54  ;;  %1512 = vmatmul.msk.f32.gmra.mxu3 %vm665_vm1, %v468_v55  ;;  %v457_v54 = vld [vmem:[%s2384_s2 + $0x80] sm:$0xff] }
  0xb2   : > { %v2166_v21 = vpop.permute.xlu1 %642 }
  0xb3   : > { %v2196_v33 = vpop.permute.xlu0 %637 }
  0xb5   : > { %v2204_v36 = vpop.permute.xlu2 %542 }
  0xb7   : > { %1488 = vmatmul.msk.f32.gmra.mxu0 %vm665_vm1, %v444_v57 }
  0xb8   : > { %1505 = vmatmul.msk.f32.gmra.mxu1 %vm665_vm1, %v461_v58  ;;  %1513 = vmatmul.msk.f32.gmra.mxu3 %vm665_vm1, %v469_v59 }
  0xba   : > { %v2178_v27 = vpop.permute.xlu1 %627 }
  0xbb   : > { %v2209_v39 = vpop.permute.xlu0 %562 }
  0xbd   : > { %v528_v43 = vpop.permute.xlu2 %527 }
  0xbf   : > { %1489 = vmatmul.msk.f32.gmra.mxu0 %vm665_vm1, %v445_v63 }
  0xc0   : > { %1506 = vmatmul.msk.f32.gmra.mxu1 %vm665_vm1, %v462_v0  ;;  %1514 = vmatmul.msk.f32.gmra.mxu3 %vm665_vm1, %v470_v1 }
  0xc2   : > { %v2191_v3 = vpop.permute.xlu1 %552 }
  0xc3   : > { %v2218_v44 = vpop.permute.xlu0 %547 }
  0xc5   : > { %v2225_v47 = vpop.permute.xlu2 %602 }
  0xc7   : > { %1490 = vmatmul.msk.f32.gmra.mxu0 %vm665_vm1, %v446_v6 }
  0xc8   : > { %1507 = vmatmul.msk.f32.gmra.mxu1 %vm665_vm1, %v463_v8  ;;  %1515 = vmatmul.msk.f32.gmra.mxu3 %vm665_vm1, %v471_v9 }
  0xca   : > { %v2201_v35 = vpop.permute.xlu1 %537 }
  0xcb   : > { %v2228_v48 = vpop.permute.xlu0 %622 }
  0xcd   : > { %v2234_v51 = vpop.permute.xlu2 %587 }
  0xcf   : > { %1491 = vmatmul.msk.f32.gmra.mxu0 %vm665_vm1, %v447_v13 }
  0xd0   : > { %1508 = vmatmul.msk.f32.gmra.mxu1 %vm665_vm1, %v464_v14  ;;  %1516 = vmatmul.msk.f32.gmra.mxu3 %vm665_vm1, %v472_v15 }
  0xd2   : > { %v2212_v41 = vpop.permute.xlu1 %612 }
  0xd3   : > { %v2236_v52 = vpop.permute.xlu0 %607 }
  0xd5   : > { %v513_v58 = vpop.permute.xlu2 %512 }
  0xd7   : > { %1492 = vmatmul.msk.f32.gmra.mxu0 %vm665_vm1, %v448_v19 }
  0xd8   : > { %1509 = vmatmul.msk.f32.gmra.mxu1 %vm665_vm1, %v465_v20 }
  0xda   : > { %v2220_v45 = vpop.permute.xlu1 %597 }
  0xdb   : > { %v533_v1 = vpop.permute.xlu0 %532 }
  0xdf   : > { %1493 = vmatmul.msk.f32.gmra.mxu0 %vm665_vm1, %v449_v23 }
  0xe2   : > { %v523_v49 = vpop.permute.xlu1 %522 }
  0xe3   : > { %v518_v13 = vpop.permute.xlu0 %517 }
  0xe7   : > { %1494 = vmatmul.msk.f32.gmra.mxu0 %vm665_vm1, %v450_v28 }
  0xea   : > { %v508_v56 = vpop.permute.xlu1 %507 }
  0xef   : > { %1495 = vmatmul.msk.f32.gmra.mxu0 %vm665_vm1, %v451_v31 }
  0xf7   : > { %1496 = vmatmul.msk.f32.gmra.mxu0 %vm665_vm1, %v452_v34 }
  0xff   : > { %1497 = vmatmul.msk.f32.gmra.mxu0 %vm665_vm1, %v453_v37 }
 0x107   : > { %1498 = vmatmul.msk.f32.gmra.mxu0 %vm665_vm1, %v454_v42 }
 0x10f   : > { %1499 = vmatmul.msk.f32.gmra.mxu0 %vm665_vm1, %v455_v46 }
 0x117   : > { %1500 = vmatmul.msk.f32.gmra.mxu0 %vm665_vm1, %v456_v50 }
 0x11c   : > { %v783_v53 = vpop.f32.mrf.mxu0 }
 0x11d   : > { %v2241_v55 = vpop.f32.mrf.mxu1  ;;  %v784_v57 = vadd.f32 %v783_v53, %v508_v56 }
 0x11f   : > { %1501 = vmatmul.msk.f32.gmra.mxu0 %vm665_vm1, %v457_v54  ;;  %v879_v62 = vmul.f32 0.01, %v784_v57 }
 0x121   : > { %v911_v5 = vmax.f32 %v784_v57, %v879_v62 }
 0x123   : > { %v858_v59 = vpop.f32.mrf.mxu3 }
 0x124   : > { %v786_v61 = vpop.f32.mrf.mxu0 }
 0x125   : > { %v787_v63 = vadd.f32 %v786_v61, %v513_v58  ;;  %v2244_v0 = vpop.f32.mrf.mxu1 }
 0x127   : > { %v880_v4 = vmul.f32 0.01, %v787_v63 }
 0x129   : > { %v912_v6 = vmax.f32 %v787_v63, %v880_v4 }
 0x12b   : > { %v861_v8 = vpop.f32.mrf.mxu3  ;;  %v2246_v9 = vpack.c.bf16 %v912_v6, %v911_v5 }
 0x12c   : > { %v789_v11 = vpop.f32.mrf.mxu0 }
 0x12d   : > { %v2248_v12 = vpop.f32.mrf.mxu1  ;;  %v790_v14 = vadd.f32 %v789_v11, %v518_v13 }
 0x12f   : > { %v881_v19 = vmul.f32 0.01, %v790_v14 }
 0x131   : > { %v913_v25 = vmax.f32 %v790_v14, %v881_v19 }
 0x133   : > { %v864_v15 = vpop.f32.mrf.mxu3 }
 0x134   : > { %v792_v18 = vpop.f32.mrf.mxu0 }
 0x135   : > { %v793_v20 = vadd.f32 %v792_v18, %v523_v49  ;;  %v2250_v22 = vpop.f32.mrf.mxu1 }
 0x137   : > { %v882_v23 = vmul.f32 0.01, %v793_v20 }
 0x139   : > { %v914_v28 = vmax.f32 %v793_v20, %v882_v23 }
 0x13b   : > { %v867_v31 = vpop.f32.mrf.mxu3  ;;  %v2252_v34 = vpack.c.bf16 %v914_v28, %v913_v25  ;;  %v865_v28 = vadd.f32 %v864_v15, %v2166_v21 }
 0x13c   : > { %v795_v37 = vpop.f32.mrf.mxu0 }
 0x13d   : > { %v796_v42 = vadd.f32 %v795_v37, %v528_v43  ;;  %v846_v46 = vpop.f32.mrf.mxu1  ;;  %v868_v43 = vadd.f32 %v867_v31, %v2134_v10  ;;  %v862_v10 = vadd.f32 %v861_v8, %v2196_v33 }
 0x13f   : > { %v883_v54 = vmul.f32 0.01, %v796_v42  ;;  %v907_v37 = vmul.f32 0.01, %v868_v43  ;;  %v905_v15 = vmul.f32 0.01, %v862_v10 }
 0x141   : > { %v915_v61 = vmax.f32 %v796_v42, %v883_v54 }
 0x143   : > { %v870_v50 = vpop.f32.mrf.mxu3 }
 0x144   : > { %v798_v53 = vpop.f32.mrf.mxu0  ;;  %v871_v13 = vadd.f32 %v870_v50, %v2186_v30 }
 0x145   : > { %v799_v56 = vadd.f32 %v798_v53, %v533_v1  ;;  %v849_v57 = vpop.f32.mrf.mxu1 }
 0x146   : > { %v908_v42 = vmul.f32 0.01, %v871_v13  ;;  %v850_v33 = vadd.f32 %v849_v57, %v2194_v32  ;;  %v838_v32 = vadd.f32 %v2244_v0, %v2220_v45 }
 0x147   : > { %v884_v58 = vmul.f32 0.01, %v799_v56 }
 0x149   : > { %v916_v62 = vmax.f32 %v799_v56, %v884_v58  ;;  %v906_v56 = vmul.f32 0.01, %v865_v28  ;;  %v939_v58 = vmax.f32 %v868_v43, %v907_v37  ;;  %v847_v43 = vadd.f32 %v846_v46, %v2212_v41 }
 0x14a   : > { %v897_v41 = vmul.f32 0.01, %v838_v32 }
 0x14b   : > { %v873_v49 = vpop.f32.mrf.mxu3  ;;  %v2254_v63 = vpack.c.bf16 %v916_v62, %v915_v61  ;;  %v900_v57 = vmul.f32 0.01, %v847_v43 }
 0x14c   : > { %v801_v4 = vpop.f32.mrf.mxu0  ;;  %v874_v6 = vadd.f32 %v873_v49, %v2176_v26 }
 0x14d   : > { %v852_v5 = vpop.f32.mrf.mxu1  ;;  %v802_v11 = vadd.f32 %v801_v4, %v2201_v35  ;;  %v859_v35 = vadd.f32 %v858_v59, %v2183_v29  ;;  %v938_v59 = vmax.f32 %v865_v28, %v906_v56  ;;  %v932_v28 = vmax.f32 %v847_v43, %v900_v57  ;;  %v593_v56 = vpop.permute.xlu0 %592 }
 0x14e   : > { %v909_v18 = vmul.f32 0.01, %v874_v6  ;;  %v853_v8 = vadd.f32 %v852_v5, %v2228_v48  ;;  %v841_v48 = vadd.f32 %v2248_v12, %v2225_v47 }
 0x14f   : > { %v885_v20 = vmul.f32 0.01, %v802_v11  ;;  %v904_v21 = vmul.f32 0.01, %v859_v35 }
 0x150   : > { %v941_v30 = vmax.f32 %v874_v6, %v909_v18  ;;  %v937_v6 = vmax.f32 %v862_v10, %v905_v15  ;;  %v898_v46 = vmul.f32 0.01, %v841_v48 }
 0x151   : > { %v936_v4 = vmax.f32 %v859_v35, %v904_v21  ;;  %v835_v21 = vadd.f32 %v2241_v55, %v593_v56 }
 0x152   : > { %v967_v18 = vpack.c.bf16 %v938_v59, %v937_v6 }
 0x153   : > { %v876_v14 = vpop.f32.mrf.mxu3 }
 0x154   : > { %v877_v1 = vadd.f32 %v876_v14, %v2100_v60  ;;  %v804_v19 = vpop.f32.mrf.mxu0  ;;  %v917_v60 = vmax.f32 %v802_v11, %v885_v20  ;;  %v902_v14 = vmul.f32 0.01, %v853_v8 }
 0x155   : > { %v805_v23 = vadd.f32 %v804_v19, %v2204_v36  ;;  %v855_v25 = vpop.f32.mrf.mxu1  ;;  %v940_v36 = vmax.f32 %v871_v13, %v908_v42  ;;  %v901_v13 = vmul.f32 0.01, %v850_v33 }
 0x156   : > { %v910_v26 = vmul.f32 0.01, %v877_v1  ;;  %v856_v50 = vadd.f32 %v855_v25, %v2178_v27 }
 0x157   : > { %v886_v53 = vmul.f32 0.01, %v805_v23  ;;  %v968_v27 = vpack.c.bf16 %v940_v36, %v939_v58  ;;  %v933_v5 = vmax.f32 %v850_v33, %v901_v13 }
 0x158   : > { %v942_v31 = vmax.f32 %v877_v1, %v910_v26  ;;  %v903_v29 = vmul.f32 0.01, %v856_v50  ;;  %v844_v1 = vadd.f32 %v2250_v22, %v2236_v52  ;;  %v929_v22 = vmax.f32 %v838_v32, %v897_v41  ;;  %v1521_v41 = vld [vmem:[%s2295_s22] sm:$0xf] }
 0x159   : > { %v918_v54 = vmax.f32 %v805_v23, %v886_v53  ;;  %v934_v23 = vmax.f32 %v853_v8, %v902_v14  ;;  %v930_v26 = vmax.f32 %v841_v48, %v898_v46  ;;  %v1582_v46 = vld [vmem:[%s2295_s22 + $0x4] sm:$0xf0] }
 0x15a   : > { %v969_v61 = vpack.c.bf16 %v942_v31, %v941_v30  ;;  %v935_v11 = vmax.f32 %v856_v50, %v903_v29  ;;  %v899_v25 = vmul.f32 0.01, %v844_v1 }
 0x15b   : > { %v2266_v62 = vpack.c.bf16 %v918_v54, %v917_v60  ;;  %v965_v37 = vpack.c.bf16 %v934_v23, %v933_v5  ;;  %v963_v45 = vpack.c.bf16 %v930_v26, %v929_v22  ;;  %v1583_v5 = vld [vmem:[%s2295_s22 + $0x14] sm:$0xf]  ;;  %v1531_v23 = vld [vmem:[%s2295_s22 + $0x18] sm:$0xf0] }
 0x15c   : > { %1087 = vmatpush.bf16.msra.mxu2 %v969_v61  ;;  %v2268_v49 = vpop.f32.mrf.mxu0  ;;  %v966_v20 = vpack.c.bf16 %v936_v4, %v935_v11  ;;  %v931_v42 = vmax.f32 %v844_v1, %v899_v25  ;;  %v1534_v25 = vor.u32 %v1583_v5, %v1531_v23  ;;  %v1547_v26 = vld [vmem:[%s2295_s22 + $0x38] sm:$0xf0] }
 0x15e   : > { %v964_v35 = vpack.c.bf16 %v932_v28, %v931_v42  ;;  %v1522_v28 = vor.u32 %v1582_v46, %v1521_v41  ;;  %v1529_v42 = vld [vmem:[%s2295_s22 + $0x10] sm:$0xf] }
 0x160   : > { %1088 = vmatpush.bf16.msra.mxu2 %v968_v27  ;;  %v896_v27 = vmul.f32 0.01, %v835_v21 }
 0x162   : > { %v928_v13 = vmax.f32 %v835_v21, %v896_v27 }
 0x164   : > { %1089 = vmatpush.bf16.msra.mxu2 %v967_v18  ;;  %v810_v19 = vpop.f32.mrf.mxu0  ;;  %v1523_v18 = vld [vmem:[%s2295_s22 + $0x8] sm:$0xf0] }
 0x168   : > { %1090 = vmatpush.bf16.msra.mxu2 %v966_v20 }
 0x16c   : > { %1091 = vmatpush.bf16.msra.mxu2 %v965_v37  ;;  %v813_v52 = vpop.f32.mrf.mxu0  ;;  %v1539_v37 = vld [vmem:[%s2295_s22 + $0x28] sm:$0xf0] }
 0x16d   : > { %v814_v15 = vadd.f32 %v813_v52, %v2172_v24  ;;  %v1584_v52 = vld [vmem:[%s2295_s22 + $0x14] sm:$0xf0] }
 0x16e   : > { %v1530_v22 = vor.u32 %v1584_v52, %v1529_v42 }
 0x16f   : > { %v889_v4 = vmul.f32 0.01, %v814_v15 }
 0x170   : > { %1092 = vmatpush.bf16.msra.mxu2 %v964_v35 }
 0x174   : > { %1093 = vmatpush.bf16.msra.mxu2 %v963_v45  ;;  %v816_v0 = vpop.f32.mrf.mxu0  ;;  %v1537_v45 = vld [vmem:[%s2295_s22 + $0x20] sm:$0xf] }
 0x175   : > { %v817_v58 = vadd.f32 %v816_v0, %v2209_v39  ;;  %v808_v39 = vadd.f32 %v2268_v49, %v2218_v44  ;;  %v921_v44 = vmax.f32 %v814_v15, %v889_v4  ;;  %v1586_v0 = vld [vmem:[%s2295_s22 + $0x24] sm:$0xf0] }
 0x177   : > { %v890_v33 = vmul.f32 0.01, %v817_v58  ;;  %v887_v14 = vmul.f32 0.01, %v808_v39 }
 0x179   : > { %v919_v48 = vmax.f32 %v808_v39, %v887_v14 }
 0x17c   : > { %v819_v47 = vpop.f32.mrf.mxu0 }
 0x17d   : > { %v820_v50 = vadd.f32 %v819_v47, %v2150_v16  ;;  %v1538_v47 = vor.u32 %v1586_v0, %v1537_v45 }
 0x17f   : > { %v891_v29 = vmul.f32 0.01, %v820_v50 }
 0x181   : > { %v923_v6 = vmax.f32 %v820_v50, %v891_v29 }
 0x184   : > { %v822_v12 = vpop.f32.mrf.mxu0 }
 0x185   : > { %v823_v30 = vadd.f32 %v822_v12, %v2155_v17  ;;  %v811_v17 = vadd.f32 %v810_v19, %v2191_v3  ;;  %v922_v3 = vmax.f32 %v817_v58, %v890_v33  ;;  %v1588_v12 = vld [vmem:[%s2295_s22 + $0x34] sm:$0xf0]  ;;  %v1016_v33 = vpop.permute.xlu1 %1015 }
 0x187   : > { %v892_v36 = vmul.f32 0.01, %v823_v30  ;;  %v888_v24 = vmul.f32 0.01, %v811_v17  ;;  %v959_v19 = vpack.c.bf16 %v922_v3, %v921_v44 }
 0x189   : > { %v924_v16 = vmax.f32 %v823_v30, %v892_v36  ;;  %v920_v1 = vmax.f32 %v811_v17, %v888_v24 }
 0x18b   : > { %v960_v43 = vpack.c.bf16 %v924_v16, %v923_v6  ;;  %v958_v57 = vpack.c.bf16 %v920_v1, %v919_v48 }
 0x18c   : > { %v825_v53 = vpop.f32.mrf.mxu0 }
 0x18d   : > { %v826_v10 = vadd.f32 %v825_v53, %v2123_v7  ;;  %v991_v39 = vpop.permute.xlu1 %990 }
 0x18f   : > { %v893_v60 = vmul.f32 0.01, %v826_v10 }
 0x191   : > { %v925_v7 = vmax.f32 %v826_v10, %v893_v60  ;;  %v1011_v10 = vpop.permute.xlu0 %1010 }
 0x194   : > { %v828_v31 = vpop.f32.mrf.mxu0 }
 0x195   : > { %v829_v54 = vadd.f32 %v828_v31, %v2113_v2 }
 0x197   : > { %v894_v61 = vmul.f32 0.01, %v829_v54 }
 0x199   : > { %v926_v59 = vmax.f32 %v829_v54, %v894_v61  ;;  %v1006_v31 = vpop.permute.xlu0 %1005 }
 0x19b   : > { %v961_v8 = vpack.c.bf16 %v926_v59, %v925_v7 }
 0x19c   : > { %v831_v2 = vpop.f32.mrf.mxu0 }
 0x19d   : > { %v832_v55 = vadd.f32 %v831_v2, %v2234_v51  ;;  %1058 = vmatpush.bf16.msrb.mxu1 %v961_v8  ;;  %v1581_v51 = vld [vmem:[%s2295_s22 + $0x4] sm:$0xf]  ;;  %v1001_v8 = vpop.permute.xlu2 %1000 }
 0x19e   : > { %v1526_v32 = vor.u32 %v1581_v51, %v1523_v18 }
 0x19f   : > { %v895_v11 = vmul.f32 0.01, %v832_v55 }
 0x1a1   : > { %v927_v49 = vmax.f32 %v832_v55, %v895_v11  ;;  %1059 = vmatpush.bf16.msrb.mxu1 %v960_v43  ;;  %v981_v60 = vpop.permute.xlu0 %980 }
 0x1a3   : > { %v962_v20 = vpack.c.bf16 %v928_v13, %v927_v49 }
 0x1a5   : > { %1060 = vmatpush.bf16.msrb.mxu1 %v959_v19  ;;  %1094 = vmatpush.bf16.msra.mxu2 %v962_v20  ;;  %v996_v3 = vpop.permute.xlu2 %995  ;;  %v986_v19 = vpop.permute.xlu1 %985 }
 0x1a8   : > { %1095 = vmatmul.bf16.vlgmr.msra.gmra.mxu2 %v1526_v32 }
 0x1a9   : > { %1061 = vmatpush.bf16.msrb.mxu1 %v958_v57 }
 0x1ad   : > { %1062 = vmatpush.bf16.msrb.mxu1 %v2266_v62  ;;  %v1585_v62 = vld [vmem:[%s2295_s22 + $0x24] sm:$0xf] }
 0x1b1   : > { %1063 = vmatpush.bf16.msrb.mxu1 %v2254_v63  ;;  %v1542_v63 = vor.u32 %v1585_v62, %v1539_v37 }
 0x1b5   : > { %1064 = vmatpush.bf16.msrb.mxu1 %v2252_v34  ;;  %v1587_v34 = vld [vmem:[%s2295_s22 + $0x34] sm:$0xf] }
 0x1b6   : > { %v1550_v35 = vor.u32 %v1587_v34, %v1547_v26 }
 0x1b8   : > { %1100 = vmatmul.bf16.gmra.mxu2 %v1534_v25 }
 0x1b9   : > { %1065 = vmatpush.bf16.msrb.mxu1 %v2246_v9  ;;  %v1545_v9 = vld [vmem:[%s2295_s22 + $0x30] sm:$0xf]  ;;  %s1357_s22 = sshll.u32 %s406_s12, 4  ;;  %s1358_s22 = int_to_ptr.vmem [resolvable:$true] %s1357_s22 }
 0x1ba   : > { %v1546_v53 = vor.u32 %v1588_v12, %v1545_v9  ;;  %v1590_v12 = vld [vmem:[%s1133_s29] sm:$0xff] }
 0x1bc   : > { %1066 = vmatmul.bf16.vlgmr.msrb.gmra.mxu1 %v1522_v28 }
 0x1c8   : > { %1105 = vmatmul.bf16.gmra.mxu2 %v1542_v63 }
 0x1cc   : > { %1071 = vmatmul.bf16.gmra.mxu1 %v1530_v22 }
 0x1d8   : > { %1110 = vmatmul.bf16.gmra.mxu2 %v1550_v35 }
 0x1dc   : > { %1076 = vmatmul.bf16.gmra.mxu1 %v1538_v47 }
 0x1ec   : > { %1081 = vmatmul.bf16.gmra.mxu1 %v1546_v53  ;;  %v1591_v53 = vld [vmem:[%s1133_s29 + $0x8] sm:$0xff] }
 0x22b   : > { %v1096_v30 = vpop.f32.mrf.mxu2 }
 0x233   : > { %v1098_v50 = vpop.f32.mrf.mxu2 }
 0x239   : > { %v1067_v54 = vpop.f32.mrf.mxu1 }
 0x23a   : > { %v1068_v56 = vadd.f32 %v1067_v54, %v981_v60 }
 0x23b   : > { %v1101_v61 = vpop.f32.mrf.mxu2 }
 0x23c   : > { %v1097_v58 = vadd.f32 %v1096_v30, %v1068_v56  ;;  %v1593_v30 = vld [vmem:[%s1133_s29 + $0x18] sm:$0xff] }
 0x23e   : > { %v1116_v26 = vmul.f32 0.01, %v1097_v58 }
 0x240   : > { %v1124_v47 = vmax.f32 %v1097_v58, %v1116_v26 }
 0x241   : > { %v1069_v36 = vpop.f32.mrf.mxu1 }
 0x242   : > { %v1070_v20 = vadd.f32 %v1069_v36, %v986_v19  ;;  %v1194_v36 = vpop.permute.xlu2 %1193 }
 0x243   : > { %v1103_v15 = vpop.f32.mrf.mxu2 }
 0x244   : > { %v1099_v46 = vadd.f32 %v1098_v50, %v1070_v20 }
 0x246   : > { %v1117_v52 = vmul.f32 0.01, %v1099_v46 }
 0x248   : > { %v1125_v0 = vmax.f32 %v1099_v46, %v1117_v52 }
 0x249   : > { %v1072_v21 = vpop.f32.mrf.mxu1 }
 0x24a   : > { %v1073_v49 = vadd.f32 %v1072_v21, %v991_v39  ;;  %v1142_v9 = vpack.c.bf16 %v1125_v0, %v1124_v47 }
 0x24b   : > { %v1106_v7 = vpop.f32.mrf.mxu2 }
 0x24c   : > { %v1102_v5 = vadd.f32 %v1101_v61, %v1073_v49  ;;  %v1189_v61 = vpop.permute.xlu0 %1188 }
 0x24e   : > { %v1118_v63 = vmul.f32 0.01, %v1102_v5 }
 0x250   : > { %v1126_v35 = vmax.f32 %v1102_v5, %v1118_v63  ;;  %v1275_v5 = vld [vmem:[%s1274_s30] sm:$0xff]  ;;  %s1695_s30 = scalar_lea.hbm %s2392_s10, 16 }
 0x251   : > { %v1074_v29 = vpop.f32.mrf.mxu1 }
 0x252   : > { %v1075_v43 = vadd.f32 %v1074_v29, %v996_v3  ;;  %v1179_v29 = vpop.permute.xlu2 %1178 }
 0x253   : > { %v1108_v17 = vpop.f32.mrf.mxu2 }
 0x254   : > { %v1104_v32 = vadd.f32 %v1103_v15, %v1075_v43  ;;  %v1184_v15 = vpop.permute.xlu1 %1183 }
 0x256   : > { %v1119_v28 = vmul.f32 0.01, %v1104_v32 }
 0x258   : > { %v1127_v34 = vmax.f32 %v1104_v32, %v1119_v28 }
 0x259   : > { %v1077_v59 = vpop.f32.mrf.mxu1 }
 0x25a   : > { %v1078_v55 = vadd.f32 %v1077_v59, %v1001_v8  ;;  %v1143_v45 = vpack.c.bf16 %v1127_v34, %v1126_v35  ;;  %v1174_v59 = vpop.permute.xlu0 %1173  ;;  %v1164_v43 = vpop.permute.xlu2 %1163 }
 0x25b   : > { %v1111_v27 = vpop.f32.mrf.mxu2 }
 0x25c   : > { %v1107_v51 = vadd.f32 %v1106_v7, %v1078_v55  ;;  %v1169_v55 = vpop.permute.xlu1 %1168 }
 0x25e   : > { %v1120_v23 = vmul.f32 0.01, %v1107_v51 }
 0x260   : > { %v1128_v42 = vmax.f32 %v1107_v51, %v1120_v23 }
 0x261   : > { %v1079_v16 = vpop.f32.mrf.mxu1 }
 0x262   : > { %v1080_v6 = vadd.f32 %v1079_v16, %v1006_v31  ;;  %v1159_v49 = vpop.permute.xlu0 %1158 }
 0x263   : > { %v1113_v44 = vpop.f32.mrf.mxu2 }
 0x264   : > { %v1109_v13 = vadd.f32 %v1108_v17, %v1080_v6 }
 0x266   : > { %v1121_v48 = vmul.f32 0.01, %v1109_v13 }
 0x268   : > { %v1129_v37 = vmax.f32 %v1109_v13, %v1121_v48 }
 0x269   : > { %v1082_v2 = vpop.f32.mrf.mxu1 }
 0x26a   : > { %v1083_v4 = vadd.f32 %v1082_v2, %v1011_v10  ;;  %v1144_v22 = vpack.c.bf16 %v1129_v37, %v1128_v42  ;;  %v1592_v10 = vld [vmem:[%s1133_s29 + $0x10] sm:$0xff]  ;;  %s1691_s29 = scalar_lea.hbm %s1690_s28, 4 }
 0x26b   : > { %p1692_p1 = scmp.ne.s32.totalorder %s1690_s28, %s1691_s29  ;;  %p1697_p6 = scmp.lt.s32.totalorder %s1695_s30, %s1691_s29 }
 0x26c   : > { %v1112_v24 = vadd.f32 %v1111_v27, %v1083_v4 }
 0x26d   : > { %p1693_p2 = pnand %p1692_p1, %p1879_p3  ;;  %p1698_p7 = por %p1697_p6, %p1696_p5 }
 0x26e   : > { %v1122_v18 = vmul.f32 0.01, %v1112_v24 }
 0x26f   : > { %p1694_p4 = pneg %p1693_p2 }
 0x270   : > { %v1130_v25 = vmax.f32 %v1112_v24, %v1122_v18 }
 0x271   : > { %v1084_v11 = vpop.f32.mrf.mxu1  ;;  %p1699_p9 = pnand %p1698_p7, %p1694_p4 }
 0x272   : > { %v1085_v14 = vadd.f32 %v1084_v11, %v1016_v33 }
 0x274   : > { %v1114_v1 = vadd.f32 %v1113_v44, %v1085_v14 }
 0x276   : > { %v1123_v57 = vmul.f32 0.01, %v1114_v1 }
 0x278   : > { %v1131_v41 = vmax.f32 %v1114_v1, %v1123_v57 }
 0x27a   : > { %v1145_v62 = vpack.c.bf16 %v1131_v41, %v1130_v25  ;;  %v1281_v25 = vpop.permute.xlu1 %1280 }
 0x27c   : > { %1233 = vmatpush.bf16.msrb.mxu3 %v1145_v62 }
 0x280   : > { %1234 = vmatpush.bf16.msrb.mxu3 %v1144_v22  ;;  %v1324_v22 = vld [vmem:[#allocation3] sm:$0x1] }
 0x284   : > { %1235 = vmatpush.bf16.msrb.mxu3 %v1143_v45 }
 0x288   : > { %1236 = vmatpush.bf16.msrb.mxu3 %v1142_v9  ;;  %v1320_v9 = vpop.permute.xlu2 %1319 }
 0x28b   : > { %1569 = vmatmul.msk.bf16.vlgmr.msrb.gmra.mxu3 %vm1216_vm2, %v1590_v12 }
 0x29b   : > { %1570 = vmatmul.msk.bf16.gmra.mxu3 %vm1216_vm2, %v1591_v53 }
 0x2ab   : > { %1571 = vmatmul.msk.bf16.gmra.mxu3 %vm1216_vm2, %v1592_v10 }
 0x2bb   : > { %1572 = vmatmul.msk.bf16.gmra.mxu3 %vm1216_vm2, %v1593_v30 }
 0x30e   : > { %v1238_v31 = vpop.f32.mrf.mxu3 }
 0x30f   : > { %v1239_v51 = vadd.f32 %v1238_v31, %v1159_v49 }
 0x311   : > { %v1258_v32 = vmul.f32 0.01, %v1239_v51 }
 0x313   : > { %v1266_v23 = vmax.f32 %v1239_v51, %v1258_v32 }
 0x316   : > { %v1240_v50 = vpop.f32.mrf.mxu3 }
 0x317   : > { %v1241_v13 = vadd.f32 %v1240_v50, %v1164_v43 }
 0x319   : > { %v1259_v19 = vmul.f32 0.01, %v1241_v13 }
 0x31b   : > { %v1267_v57 = vmax.f32 %v1241_v13, %v1259_v19 }
 0x31e   : > { %v1243_v60 = vpop.f32.mrf.mxu3 }
 0x31f   : > { %v1244_v24 = vadd.f32 %v1243_v60, %v1169_v55 }
 0x321   : > { %v1260_v18 = vmul.f32 0.01, %v1244_v24 }
 0x323   : > { %v1268_v48 = vmax.f32 %v1244_v24, %v1260_v18 }
 0x326   : > { %v1245_v54 = vpop.f32.mrf.mxu3 }
 0x327   : > { %v1246_v39 = vadd.f32 %v1245_v54, %v1174_v59 }
 0x329   : > { %v1261_v14 = vmul.f32 0.01, %v1246_v39 }
 0x32b   : > { %v1269_v20 = vmax.f32 %v1246_v39, %v1261_v14 }
 0x32e   : > { %v1248_v56 = vpop.f32.mrf.mxu3 }
 0x32f   : > { %v1249_v8 = vadd.f32 %v1248_v56, %v1179_v29 }
 0x331   : > { %v1262_v3 = vmul.f32 0.01, %v1249_v8 }
 0x333   : > { %v1270_v1 = vmax.f32 %v1249_v8, %v1262_v3 }
 0x336   : > { %v1250_v58 = vpop.f32.mrf.mxu3 }
 0x337   : > { %v1251_v33 = vadd.f32 %v1250_v58, %v1184_v15 }
 0x339   : > { %v1263_v4 = vmul.f32 0.01, %v1251_v33 }
 0x33b   : > { %v1271_v44 = vmax.f32 %v1251_v33, %v1263_v4 }
 0x33e   : > { %v1253_v21 = vpop.f32.mrf.mxu3 }
 0x33f   : > { %v1254_v7 = vadd.f32 %v1253_v21, %v1189_v61 }
 0x341   : > { %v1264_v27 = vmul.f32 0.01, %v1254_v7 }
 0x343   : > { %v1272_v11 = vmax.f32 %v1254_v7, %v1264_v27 }
 0x346   : > { %v1255_v17 = vpop.f32.mrf.mxu3 }
 0x347   : > { %v1256_v16 = vadd.f32 %v1255_v17, %v1194_v36 }
 0x349   : > { %v1265_v2 = vmul.f32 0.01, %v1256_v16 }
 0x34b   : > { %v1273_v6 = vmax.f32 %v1256_v16, %v1265_v2 }
 0x34d   : > { %1294 = vmatpush.msra.mxu3 %v1273_v6 }
 0x34f   : > { %1295 = vmatpush.msra.mxu3 %v1272_v11 }
 0x351   : > { %1296 = vmatpush.msra.mxu3 %v1271_v44 }
 0x353   : > { %1297 = vmatpush.msra.mxu3 %v1270_v1 }
 0x355   : > { %1298 = vmatpush.msra.mxu3 %v1269_v20 }
 0x357   : > { %1299 = vmatpush.msra.mxu3 %v1268_v48 }
 0x359   : > { %1300 = vmatpush.msra.mxu3 %v1267_v57 }
 0x35b   : > { %1301 = vmatpush.msra.mxu3 %v1266_v23 }
 0x35c   : > { %1573 = vmatmul.msk.f32.vlgmr.msra.gmra.mxu3 %vm1216_vm2, %v1275_v5 }
 0x3df   : > { %v1303_v41 = vpop.f32.mrf.mxu3 }
 0x3e0   : > { %v1304_v46 = vadd.f32 %v1303_v41, %v1281_v25 }
 0x3e2   : > { %v1574_v28 = vclamps-f32 %v1304_v46, 10.0  ;;  %v1310_v26 = vrot.slane %v1304_v46, 3 }
 0x3e4   : > { %v1313_v62 = vsub.f32 0.0, %v1574_v28  ;;  %v1326_v37 = vrot.slane %v1574_v28, 1  ;;  %v1329_v52 = vrot.slane %v1574_v28, 2  ;;  %v1312_v45 = vsub.f32 %v2030_v38, %v1310_v26 }
 0x3e6   : > { %v1314_v63 = vmul.f32 1.442695, %v1313_v62  ;;  %v1328_v42 = vadd.f32 %v1574_v28, %v1326_v37 }
 0x3e8   : > { %1673 = vpow2.f32 %v1314_v63  ;;  %v1331_v34 = vadd.f32 %v1329_v52, %v1328_v42 }
 0x3ea   : > { %v1332_v35 = vsub.f32 %v1324_v22, %v1331_v34 }
 0x3ec   : > { %1333 = vst [vmem:[#allocation3] sm:$0x1] %v1332_v35 }
 0x3ee   : > { %v1674_v0 = vpop.eup %1673 }
 0x3ef   : > { %v1316_v47 = vmul.f32 %v1674_v0, %v1312_v45 }
 0x3f1   : > { %v1322_v12 = vmul.f32 %v1320_v9, %v1316_v47 }
 0x3f3   : > { %v1323_v53 = vadd.f32 %v1322_v12, %v2033_v40  ;;  %v1672_v10 = vld [vmem:[#allocation3] ss:$0 sm:$0xff] }
 0x3f5   : > { %1334 = vst [vmem:[#allocation2] sm:$0x7] %v1323_v53  ;;  %v1339_v38 = vsel %vm762_vm0, %v1323_v53, %v1672_v10 }
 0x3f6   : > { %1340 = vst [vmem:[%s406_s12] sm:$0xf] %v1339_v38 }
 0x3f7   : > { %1702 = shalt.err (!%p1699_p9)
}
 0x3f8   : > { %1596 = dma.vmem_to_hbm [thread:$0]  (%p1879_p3), %s1358_s22, 64, %s1360_s17, %s1342_s25  }
 0x3f9 PF: > { %s2412_s12 = sld [smem:[#allocation7_spill]]  ;;  %p1602_p10 = scmp.ge.s32.totalorder %s1769_s20, 2 }
 0x3fb   : > { %p1599_p11 = pnand %p1602_p10, %p1888_p8 }
 0x3fd   : > { %p1600_p12 = pneg %p1599_p11 }
 0x3ff   : > { %s1371_s23 = sand.u32 1, %s2412_s12  }
 0x400   : > { %s1372_s11 = scalar_lea.sflag [#allocation5], %s1371_s23 }
 0x401   : > { %1736 = dma.done.wait (%p1600_p12), %s1372_s11, 64  }
 0x402   : > { %1738 = vsyncadd (%p1600_p12), %s1372_s11, 4294967232  ;;  %s23_s20 = sadd.s32 1, %s1769_s20   ;;  %s2414_s16 = sld [smem:[#allocation8_spill]] }
 0x403   : > { %p20_p13 = scmp.ge.s32.totalorder %s23_s20, 6   ;;  %s2415_s15 = sld [smem:[#allocation14_spill]] }
 0x404   : > { %s2416_s26 = sld [smem:[#allocation9_spill]]  ;;  %s2420_s13 = smov %s1745_s14 }
 0x405   : > { %s2417_s17 = sld [smem:[#allocation10_spill]] }
 0x406   : > { %s2418_s18 = sld [smem:[#allocation11_spill]]  ;;  %22 = sbr.rel (!%p20_p13) target bundleno = 5 (0x5), region = 108 }
 0x407   : > { %s2419_s19 = sld [smem:[#allocation12_spill]] }
 0x408   : > { %s2421_s14 = smov %s2414_s16 }
 0x40a   : > { %s2422_s16 = smov %s2416_s26 }
 0x40b   :  { %1378 = vsyncpa [#allocation5], 1 }
 0x40c   :  { %1380 = vsyncpa [#allocation5 + $0x1], 1 }

</bundles_post_ra>
